<compile_context>
chip_gen: v6e
topology: v6e:2x2x1
jax: 0.10.0
libtpu: 0.0.40
codegen_flags: <defaults>
</compile_context>

<pallas_src>
import functools

import jax
import jax.numpy as jnp
from jax.experimental import pallas as pl
from jax.experimental.pallas import tpu as pltpu

LANE = 128  # TPU vreg lane width; channel dims are zero-padded to this.


def _round_up(x, m):
    return ((x + m - 1) // m) * m


def _shift_w(blk, dj):
    """W-shifted copy of a (ho, wo, pp) block: out[:, j] = blk[:, j+dj], with
    zeros shifted in at the W edge (conv padding)."""
    if dj == 0:
        return blk
    ho, wo, pp = blk.shape
    zcol = jnp.zeros((ho, 1, pp), blk.dtype)
    if dj < 0:   # out[:, j] = blk[:, j-1]; column 0 is zero padding
        return jnp.concatenate([zcol, blk[:, :wo - 1, :]], axis=1)
    # dj > 0:    out[:, j] = blk[:, j+1]; column wo-1 is zero padding
    return jnp.concatenate([blk[:, 1:, :], zcol], axis=1)


# ---------------------------------------------------------------------------
# Fused Bottleneck kernel (one grid step == one image)
# ---------------------------------------------------------------------------
def _bottleneck_kernel(*refs, s, ho, wo, tr, has_projection):
    """Whole Bottleneck block for one image.

    refs (projection):  x, w1, b1, w2, b2, w3, b3, wsc, o, patch_scratch
    refs (identity):    x, w1, b1, w2, b2, w3, b3,      o, patch_scratch

    x_ref   : (1, s*s*ho*wo, Cp)  space-to-depth input (phase (0,0) rows first)
    w1_ref  : (Cp, Pp)            conv1 weight, BN1 scale folded in   (bf16)
    b1/b2/b3: (1, Pp/Pp/Ep)       folded BN shifts                    (f32)
    w2_ref  : (9*Pp, Pp)          conv2 im2col weight, BN2 folded in  (bf16)
    w3_ref  : (Pp, Ep)            conv3 weight, BN3 folded in         (bf16)
    wsc_ref : (Cp, Ep)            shortcut projection (only if present)
    o_ref   : (1, ho*wo, Ep)      output rows ordered (ho, wo)        (bf16)
    p_scr   : (ho, wo, 9*Pp)      im2col patch buffer                 (bf16)
    """
    if has_projection:
        (x_ref, w1_ref, b1_ref, w2_ref, b2_ref, w3_ref, b3_ref, wsc_ref,
         o_ref, p_scr) = refs
    else:
        (x_ref, w1_ref, b1_ref, w2_ref, b2_ref, w3_ref, b3_ref,
         o_ref, p_scr) = refs
        wsc_ref = None

    cdt = w1_ref.dtype                      # matmul operand dtype (bf16 / f32)
    pp = w1_ref.shape[1]
    mo = ho * wo

    # --- Stage 1: conv1 (1x1) + folded bn1 + relu, per stride phase ---------
    # Single f32->cdt cast right after the ReLU; results land in the im2col
    # patch scratch with the +/-1 H/W shifts baked in (aligned writes: channel
    # offsets are multiples of 128, row offsets are on the un-tiled axis 0).
    blocks = []
    for p in range(s * s):
        xp = x_ref[0, pl.ds(p * mo, mo), :]                   # (mo, Cp)
        o1 = jnp.dot(xp, w1_ref[...], preferred_element_type=jnp.float32)
        o1 = jnp.maximum(o1 + b1_ref[...], 0.0).astype(cdt)
        blocks.append(o1.reshape(ho, wo, pp))

    zrow = jnp.zeros((1, wo, pp), cdt)
    wsh_cache = {}
    for kh in range(3):
        dh = kh - 1
        ph, di = dh % s, dh // s            # source phase-row / row offset
        for kw in range(3):
            dw = kw - 1
            pw, dj = dw % s, dw // s
            key = (ph * s + pw, dj)
            if key not in wsh_cache:        # <= 3 (s=1) / 6 (s=2) W shifts
                wsh_cache[key] = _shift_w(blocks[ph * s + pw], dj)
            wsh = wsh_cache[key]
            c0 = (kh * 3 + kw) * pp
            if di == 0:
                p_scr[:, :, c0:c0 + pp] = wsh
            elif di < 0:                    # P[i] = src[i-1]; row 0 = padding
                p_scr[1:ho, :, c0:c0 + pp] = wsh[:ho - 1]
                p_scr[0:1, :, c0:c0 + pp] = zrow
            else:                           # P[i] = src[i+1]; last row = pad
                p_scr[0:ho - 1, :, c0:c0 + pp] = wsh[1:]
                p_scr[ho - 1:ho, :, c0:c0 + pp] = zrow

    # --- Stages 2+3, row-tiled: conv2 (one K=9*Pp matmul) + bn2 + relu,
    #     conv3 + bn3, shortcut add, relu, lane-dense store ------------------
    mrows = tr * wo
    nt = ho // tr

    def tile_body(r0, m0):
        patch = p_scr[pl.ds(r0, tr), :, :].reshape(mrows, 9 * pp)
        acc = jnp.dot(patch, w2_ref[...], preferred_element_type=jnp.float32)
        out2 = jnp.maximum(acc + b2_ref[...], 0.0)            # (mrows, Pp) f32
        y = jnp.dot(out2.astype(cdt), w3_ref[...],
                    preferred_element_type=jnp.float32)       # (mrows, Ep) f32
        # Phase (0,0) rows of the space-to-depth input == x[::s, ::s].
        xs = x_ref[0, pl.ds(m0, mrows), :]
        if has_projection:
            y = y + jnp.dot(xs, wsc_ref[...],
                            preferred_element_type=jnp.float32)
        else:
            y = y + xs.astype(jnp.float32)   # identity shortcut: plain VPU add
        y = y + b3_ref[...]
        o_ref[0, pl.ds(m0, mrows), :] = jnp.maximum(y, 0.0).astype(o_ref.dtype)

    if nt == 1:
        tile_body(0, 0)
    else:
        def body(t, carry):
            r0 = pl.multiple_of(t * tr, tr)
            m0 = pl.multiple_of(t * mrows, mrows)
            tile_body(r0, m0)
            return carry
        jax.lax.fori_loop(0, nt, body, 0)


# ---------------------------------------------------------------------------
# Parameter preparation (hoisted out of the forward path)
# ---------------------------------------------------------------------------
def fold_bn(gamma, beta, mean, var, eps=1e-5):
    scale = gamma / jnp.sqrt(var + eps)
    return scale, beta - mean * scale


def prepare_params(params, in_planes, planes, expansion=4,
                   operand_dtype=jnp.bfloat16):
    """Fold BN into the conv weights, transpose to matmul layout, zero-pad every
    channel dim to the 128-lane width and cast to the MXU operand dtype."""
    exp_planes = expansion * planes
    cp, pp, ep = (_round_up(c, LANE) for c in (in_planes, planes, exp_planes))

    s1, b1 = fold_bn(*params["bn1"])
    s2, b2 = fold_bn(*params["bn2"])
    s3, b3 = fold_bn(*params["bn3"])

    # OIHW torch weights -> (Cin, Cout) matmul layout, BN scale folded in.
    w1 = jnp.transpose(params["w1"][:, :, 0, 0], (1, 0)) * s1[None, :]
    w2 = (jnp.transpose(params["w2"], (2, 3, 1, 0)).reshape(9, planes, planes)
          * s2[None, None, :])
    w3 = jnp.transpose(params["w3"][:, :, 0, 0], (1, 0)) * s3[None, :]

    def pad2(a, r, c):
        return jnp.zeros((r, c), a.dtype).at[:a.shape[0], :a.shape[1]].set(a)

    # conv2 as a single (9*Pp, Pp) im2col weight; tap order = kh*3 + kw.
    w2p = (jnp.zeros((9, pp, pp), jnp.float32)
           .at[:, :planes, :planes].set(w2).reshape(9 * pp, pp))

    out = {
        "w1": pad2(w1, cp, pp).astype(operand_dtype),
        "b1": jnp.zeros((1, pp), jnp.float32).at[0, :planes].set(b1),
        "w2": w2p.astype(operand_dtype),
        "b2": jnp.zeros((1, pp), jnp.float32).at[0, :planes].set(b2),
        "w3": pad2(w3, pp, ep).astype(operand_dtype),
    }

    if "ws" in params:                      # projection (downsample) shortcut
        ss, bs = fold_bn(*params["bns"])
        wsc = jnp.transpose(params["ws"][:, :, 0, 0], (1, 0)) * ss[None, :]
        out["wsc"] = pad2(wsc, cp, ep).astype(operand_dtype)
        b3 = b3 + bs                        # both shifts add before the relu
    else:                                   # identity shortcut: no operand
        assert in_planes == exp_planes, "identity shortcut needs Cin == 4*planes"

    out["b3"] = jnp.zeros((1, ep), jnp.float32).at[0, :exp_planes].set(b3)
    return out


# ---------------------------------------------------------------------------
# Forward wrapper
# ---------------------------------------------------------------------------
def bottleneck_forward(x_nchw, prepared, stride, out_channels,
                       max_rows_per_tile=512):
    """Fused Pallas Bottleneck forward.  Input/output are NCHW (PyTorch)."""
    n, cin, h, w = x_nchw.shape
    cp, pp = prepared["w1"].shape
    ep = prepared["w3"].shape[1]
    cdt = prepared["w1"].dtype
    has_projection = "wsc" in prepared
    s = stride
    assert h % s == 0 and w % s == 0, "spatial dims must be divisible by stride"
    hs, ws = h // s, w // s                 # output spatial dims (Ho, Wo)
    mo = hs * ws
    m1 = h * w

    # Row tile (a divisor of Ho) targeting ~max_rows_per_tile output rows/tile.
    tr = 1
    for d in range(1, hs + 1):
        if hs % d == 0 and d * ws <= max_rows_per_tile:
            tr = d

    # NCHW -> NHWC, zero-pad channels to the lane width, space-to-depth by the
    # stride (row order (phase_h, phase_w, i, j)), cast to the operand dtype.
    x = jnp.transpose(x_nchw, (0, 2, 3, 1))
    x = jnp.pad(x, ((0, 0), (0, 0), (0, 0), (0, cp - cin)))
    x = x.reshape(n, hs, s, ws, s, cp).transpose(0, 2, 4, 1, 3, 5)
    x = x.reshape(n, m1, cp).astype(cdt)

    inputs = [x, prepared["w1"], prepared["b1"], prepared["w2"],
              prepared["b2"], prepared["w3"], prepared["b3"]]
    in_specs = [
        pl.BlockSpec((1, m1, cp), lambda i: (i, 0, 0)),      # x (per image)
        pl.BlockSpec((cp, pp), lambda i: (0, 0)),            # w1
        pl.BlockSpec((1, pp), lambda i: (0, 0)),             # b1
        pl.BlockSpec((9 * pp, pp), lambda i: (0, 0)),        # w2 (im2col)
        pl.BlockSpec((1, pp), lambda i: (0, 0)),             # b2
        pl.BlockSpec((pp, ep), lambda i: (0, 0)),            # w3
        pl.BlockSpec((1, ep), lambda i: (0, 0)),             # b3 (+ bns)
    ]
    if has_projection:
        inputs.append(prepared["wsc"])
        in_specs.append(pl.BlockSpec((cp, ep), lambda i: (0, 0)))

    kernel = functools.partial(_bottleneck_kernel, s=s, ho=hs, wo=ws, tr=tr,
                               has_projection=has_projection)

    bpe = jnp.dtype(cdt).itemsize
    w_bytes = (cp * pp + 9 * pp * pp + pp * ep
               + (cp * ep if has_projection else 0)) * bpe
    # Explicit VMEM budget (double-buffered I/O blocks + weights + scratch +
    # per-tile f32 temporaries), clamped to v7x's 64 MiB physical VMEM.
    vmem_need = (2 * m1 * cp * bpe + 2 * mo * ep * bpe
                 + mo * 9 * pp * bpe
                 + 2 * w_bytes + 4 * (2 * pp + ep)
                 + mo * pp * 4                               # conv1 f32 temp
                 + tr * ws * (9 * pp + 2 * pp + 2 * ep) * 4)  # tile f32 temps
    vmem_limit = min(max(2 * int(vmem_need), 32 * 1024 * 1024),
                     64 * 1024 * 1024)

    flops = 2 * n * (m1 * cp * pp + mo * 9 * pp * pp + mo * pp * ep
                     + (mo * cp * ep if has_projection else 0))
    bytes_accessed = (x.size * bpe + w_bytes + 4 * (2 * pp + ep)
                      + n * mo * ep * bpe)

    out = pl.pallas_call(
        kernel,
        out_shape=jax.ShapeDtypeStruct((n, mo, ep), cdt),    # bf16 writeback
        grid=(n,),
        in_specs=in_specs,
        out_specs=pl.BlockSpec((1, mo, ep), lambda i: (i, 0, 0)),
        scratch_shapes=[pltpu.VMEM((hs, ws, 9 * pp), cdt)],
        compiler_params=pltpu.CompilerParams(
            dimension_semantics=("parallel",),   # v7x: keep batch even/>=2
            vmem_limit_bytes=vmem_limit),
        cost_estimate=pl.CostEstimate(flops=int(flops), transcendentals=0,
                                      bytes_accessed=int(bytes_accessed)),
    )(*inputs)

    out = out.reshape(n, hs, ws, ep)[:, :, :, :out_channels]
    return jnp.transpose(out, (0, 3, 1, 2)).astype(jnp.float32)   # NCHW f32


# ---------------------------------------------------------------------------
# Pure-JAX reference (same folded-BN inference semantics, f32 end-to-end)
# ---------------------------------------------------------------------------
def bottleneck_reference(x_nchw, params, stride):
    x = jnp.transpose(x_nchw, (0, 2, 3, 1))

    def conv(inp, w_oihw, s, pad):
        w = jnp.transpose(w_oihw, (2, 3, 1, 0))              # OIHW -> HWIO
        return jax.lax.conv_general_dilated(
            inp, w, (s, s), [(pad, pad), (pad, pad)],
            dimension_numbers=("NHWC", "HWIO", "NHWC"))

    s1, b1 = fold_bn(*params["bn1"])
    s2, b2 = fold_bn(*params["bn2"])
    s3, b3 = fold_bn(*params["bn3"])

    o = jnp.maximum(conv(x, params["w1"], 1, 0) * s1 + b1, 0.0)
    o = jnp.maximum(conv(o, params["w2"], stride, 1) * s2 + b2, 0.0)
    o3 = conv(o, params["w3"], 1, 0) * s3 + b3
    if "ws" in params:
        ss, bs = fold_bn(*params["bns"])
        sc = conv(x, params["ws"], stride, 0) * ss + bs
    else:
        sc = x[:, ::stride, ::stride, :]
    return jnp.transpose(jnp.maximum(o3 + sc, 0.0), (0, 3, 1, 2))


# ---------------------------------------------------------------------------
def make_params(key, in_planes, planes, expansion=4, shortcut=True):
    ks = jax.random.split(key, 8)

    def bn_params(k, c):
        k1, k2, k3, k4 = jax.random.split(k, 4)
        gamma = 1.0 + 0.1 * jax.random.normal(k1, (c,), jnp.float32)
        beta = 0.1 * jax.random.normal(k2, (c,), jnp.float32)
        mean = 0.1 * jax.random.normal(k3, (c,), jnp.float32)
        var = 0.5 + jnp.abs(jax.random.normal(k4, (c,), jnp.float32))
        return (gamma, beta, mean, var)

    exp_planes = expansion * planes
    p = {
        "w1": 0.1 * jax.random.normal(ks[0], (planes, in_planes, 1, 1), jnp.float32),
        "bn1": bn_params(ks[1], planes),
        "w2": 0.1 * jax.random.normal(ks[2], (planes, planes, 3, 3), jnp.float32),
        "bn2": bn_params(ks[3], planes),
        "w3": 0.1 * jax.random.normal(ks[4], (exp_planes, planes, 1, 1), jnp.float32),
        "bn3": bn_params(ks[5], exp_planes),
    }
    if shortcut:
        p["ws"] = 0.1 * jax.random.normal(ks[6], (exp_planes, in_planes, 1, 1),
                                          jnp.float32)
        p["bns"] = bn_params(ks[7], exp_planes)
    return p


if __name__ == "__main__":
    key = jax.random.PRNGKey(0)
    fwd = jax.jit(bottleneck_forward,
                  static_argnames=("stride", "out_channels", "max_rows_per_tile"))

    # --- Test 1: downsample Bottleneck(in_planes=8, planes=4, stride=2) -----
    batch, in_planes, planes, hw, stride = 2, 8, 4, 16, 2
    k1, k2, key = jax.random.split(key, 3)
    x = jax.random.normal(k1, (batch, in_planes, hw, hw), jnp.float32)   # NCHW
    params = make_params(k2, in_planes, planes, shortcut=True)
    prepared = prepare_params(params, in_planes, planes)     # bf16 operands
    out = jax.block_until_ready(
        fwd(x, prepared, stride=stride, out_channels=4 * planes))
    ref = jax.block_until_ready(bottleneck_reference(x, params, stride))
    assert out.shape == (batch, 4 * planes, hw // stride, hw // stride), out.shape
    err = float(jnp.max(jnp.abs(out - ref)))
    assert jnp.allclose(out, ref, atol=3e-2, rtol=3e-2), (
        "mismatch (downsample), max abs err %g" % err)

    # --- Test 2: identity-shortcut Bottleneck(in_planes=16, planes=4, stride=1)
    #     max_rows_per_tile=128 forces the multi-row-tile (fori_loop) path.
    in_planes2, planes2, stride2 = 16, 4, 1
    k1, k2, key = jax.random.split(key, 3)
    x2 = jax.random.normal(k1, (batch, in_planes2, hw, hw), jnp.float32)
    params2 = make_params(k2, in_planes2, planes2, shortcut=False)
    prepared2 = prepare_params(params2, in_planes2, planes2)
    out2 = jax.block_until_ready(
        fwd(x2, prepared2, stride=stride2, out_channels=4 * planes2,
            max_rows_per_tile=128))
    ref2 = jax.block_until_ready(bottleneck_reference(x2, params2, stride2))
    assert out2.shape == (batch, 4 * planes2, hw, hw), out2.shape
    err2 = float(jnp.max(jnp.abs(out2 - ref2)))
    assert jnp.allclose(out2, ref2, atol=3e-2, rtol=3e-2), (
        "mismatch (identity), max abs err %g" % err2)

    print("KERNEL_OK")
</pallas_src>

<mosaic_0001>
module attributes {stable_mosaic.version = 11 : i64} {
  func.func @_bottleneck_kernel(%arg0: i32, %arg1: memref<1x256x128xbf16, #tpu.memory_space<vmem>>, %arg2: memref<128x128xbf16, #tpu.memory_space<vmem>>, %arg3: memref<1x128xf32, #tpu.memory_space<vmem>>, %arg4: memref<1152x128xbf16, #tpu.memory_space<vmem>>, %arg5: memref<1x128xf32, #tpu.memory_space<vmem>>, %arg6: memref<128x128xbf16, #tpu.memory_space<vmem>>, %arg7: memref<1x128xf32, #tpu.memory_space<vmem>>, %arg8: memref<128x128xbf16, #tpu.memory_space<vmem>>, %arg9: memref<1x64x128xbf16, #tpu.memory_space<vmem>>, %arg10: memref<8x8x1152xbf16, #tpu.memory_space<vmem>>) attributes {dimension_semantics = [#tpu.dimension_semantics<parallel>], iteration_bounds = array<i64: 2>, scalar_prefetch = 0 : i64, scratch_operands = 1 : i64, tpu.core_type = #tpu.core_type<tc>, window_params = [{transform_indices = @transform_0, window_bounds = array<i64: 1, 256, 128>}, {pipeline_mode = #tpu.pipeline_mode<synchronous>, transform_indices = @transform_1, window_bounds = array<i64: 128, 128>}, {pipeline_mode = #tpu.pipeline_mode<synchronous>, transform_indices = @transform_2, window_bounds = array<i64: 1, 128>}, {pipeline_mode = #tpu.pipeline_mode<synchronous>, transform_indices = @transform_3, window_bounds = array<i64: 1152, 128>}, {pipeline_mode = #tpu.pipeline_mode<synchronous>, transform_indices = @transform_4, window_bounds = array<i64: 1, 128>}, {pipeline_mode = #tpu.pipeline_mode<synchronous>, transform_indices = @transform_5, window_bounds = array<i64: 128, 128>}, {pipeline_mode = #tpu.pipeline_mode<synchronous>, transform_indices = @transform_6, window_bounds = array<i64: 1, 128>}, {pipeline_mode = #tpu.pipeline_mode<synchronous>, transform_indices = @transform_7, window_bounds = array<i64: 128, 128>}, {transform_indices = @transform_8, window_bounds = array<i64: 1, 64, 128>}]} {
    %c0 = arith.constant 0 : index
    %c0_0 = arith.constant 0 : index
    %c0_1 = arith.constant 0 : index
    %0 = vector.load %arg1[%c0, %c0_0, %c0_1] : memref<1x256x128xbf16, #tpu.memory_space<vmem>>, vector<1x64x128xbf16>
    %1 = vector.shape_cast %0 : vector<1x64x128xbf16> to vector<64x128xbf16>
    %c0_2 = arith.constant 0 : index
    %c0_3 = arith.constant 0 : index
    %2 = vector.load %arg2[%c0_2, %c0_3] : memref<128x128xbf16, #tpu.memory_space<vmem>>, vector<128x128xbf16>
    %cst = arith.constant dense<0.000000e+00> : vector<64x128xf32>
    %3 = tpu.matmul %1, %2, %cst {dimension_numbers = #tpu.dot_dimension_numbers<[1], [0], [0], [1], [0, 0, 1, 1], [], []>} : vector<64x128xbf16>, vector<128x128xbf16>, vector<64x128xf32> -> vector<64x128xf32>
    %c0_4 = arith.constant 0 : index
    %c0_5 = arith.constant 0 : index
    %4 = vector.load %arg3[%c0_4, %c0_5] : memref<1x128xf32, #tpu.memory_space<vmem>>, vector<1x128xf32>
    %5 = vector.broadcast %4 : vector<1x128xf32> to vector<64x128xf32>
    %6 = arith.addf %3, %5 : vector<64x128xf32>
    %cst_6 = arith.constant 0.000000e+00 : f32
    %7 = vector.broadcast %cst_6 : f32 to vector<64x128xf32>
    %8 = arith.maximumf %6, %7 : vector<64x128xf32>
    %9 = arith.truncf %8 : vector<64x128xf32> to vector<64x128xbf16>
    %10 = vector.shape_cast %9 : vector<64x128xbf16> to vector<8x8x128xbf16>
    %c0_7 = arith.constant 0 : index
    %c64 = arith.constant 64 : index
    %c0_8 = arith.constant 0 : index
    %11 = vector.load %arg1[%c0_7, %c64, %c0_8] : memref<1x256x128xbf16, #tpu.memory_space<vmem>>, vector<1x64x128xbf16>
    %12 = vector.shape_cast %11 : vector<1x64x128xbf16> to vector<64x128xbf16>
    %c0_9 = arith.constant 0 : index
    %c0_10 = arith.constant 0 : index
    %13 = vector.load %arg2[%c0_9, %c0_10] : memref<128x128xbf16, #tpu.memory_space<vmem>>, vector<128x128xbf16>
    %cst_11 = arith.constant dense<0.000000e+00> : vector<64x128xf32>
    %14 = tpu.matmul %12, %13, %cst_11 {dimension_numbers = #tpu.dot_dimension_numbers<[1], [0], [0], [1], [0, 0, 1, 1], [], []>} : vector<64x128xbf16>, vector<128x128xbf16>, vector<64x128xf32> -> vector<64x128xf32>
    %c0_12 = arith.constant 0 : index
    %c0_13 = arith.constant 0 : index
    %15 = vector.load %arg3[%c0_12, %c0_13] : memref<1x128xf32, #tpu.memory_space<vmem>>, vector<1x128xf32>
    %16 = vector.broadcast %15 : vector<1x128xf32> to vector<64x128xf32>
    %17 = arith.addf %14, %16 : vector<64x128xf32>
    %cst_14 = arith.constant 0.000000e+00 : f32
    %18 = vector.broadcast %cst_14 : f32 to vector<64x128xf32>
    %19 = arith.maximumf %17, %18 : vector<64x128xf32>
    %20 = arith.truncf %19 : vector<64x128xf32> to vector<64x128xbf16>
    %21 = vector.shape_cast %20 : vector<64x128xbf16> to vector<8x8x128xbf16>
    %c0_15 = arith.constant 0 : index
    %c128 = arith.constant 128 : index
    %c0_16 = arith.constant 0 : index
    %22 = vector.load %arg1[%c0_15, %c128, %c0_16] : memref<1x256x128xbf16, #tpu.memory_space<vmem>>, vector<1x64x128xbf16>
    %23 = vector.shape_cast %22 : vector<1x64x128xbf16> to vector<64x128xbf16>
    %c0_17 = arith.constant 0 : index
    %c0_18 = arith.constant 0 : index
    %24 = vector.load %arg2[%c0_17, %c0_18] : memref<128x128xbf16, #tpu.memory_space<vmem>>, vector<128x128xbf16>
    %cst_19 = arith.constant dense<0.000000e+00> : vector<64x128xf32>
    %25 = tpu.matmul %23, %24, %cst_19 {dimension_numbers = #tpu.dot_dimension_numbers<[1], [0], [0], [1], [0, 0, 1, 1], [], []>} : vector<64x128xbf16>, vector<128x128xbf16>, vector<64x128xf32> -> vector<64x128xf32>
    %c0_20 = arith.constant 0 : index
    %c0_21 = arith.constant 0 : index
    %26 = vector.load %arg3[%c0_20, %c0_21] : memref<1x128xf32, #tpu.memory_space<vmem>>, vector<1x128xf32>
    %27 = vector.broadcast %26 : vector<1x128xf32> to vector<64x128xf32>
    %28 = arith.addf %25, %27 : vector<64x128xf32>
    %cst_22 = arith.constant 0.000000e+00 : f32
    %29 = vector.broadcast %cst_22 : f32 to vector<64x128xf32>
    %30 = arith.maximumf %28, %29 : vector<64x128xf32>
    %31 = arith.truncf %30 : vector<64x128xf32> to vector<64x128xbf16>
    %32 = vector.shape_cast %31 : vector<64x128xbf16> to vector<8x8x128xbf16>
    %c0_23 = arith.constant 0 : index
    %c192 = arith.constant 192 : index
    %c0_24 = arith.constant 0 : index
    %33 = vector.load %arg1[%c0_23, %c192, %c0_24] : memref<1x256x128xbf16, #tpu.memory_space<vmem>>, vector<1x64x128xbf16>
    %34 = vector.shape_cast %33 : vector<1x64x128xbf16> to vector<64x128xbf16>
    %c0_25 = arith.constant 0 : index
    %c0_26 = arith.constant 0 : index
    %35 = vector.load %arg2[%c0_25, %c0_26] : memref<128x128xbf16, #tpu.memory_space<vmem>>, vector<128x128xbf16>
    %cst_27 = arith.constant dense<0.000000e+00> : vector<64x128xf32>
    %36 = tpu.matmul %34, %35, %cst_27 {dimension_numbers = #tpu.dot_dimension_numbers<[1], [0], [0], [1], [0, 0, 1, 1], [], []>} : vector<64x128xbf16>, vector<128x128xbf16>, vector<64x128xf32> -> vector<64x128xf32>
    %c0_28 = arith.constant 0 : index
    %c0_29 = arith.constant 0 : index
    %37 = vector.load %arg3[%c0_28, %c0_29] : memref<1x128xf32, #tpu.memory_space<vmem>>, vector<1x128xf32>
    %38 = vector.broadcast %37 : vector<1x128xf32> to vector<64x128xf32>
    %39 = arith.addf %36, %38 : vector<64x128xf32>
    %cst_30 = arith.constant 0.000000e+00 : f32
    %40 = vector.broadcast %cst_30 : f32 to vector<64x128xf32>
    %41 = arith.maximumf %39, %40 : vector<64x128xf32>
    %42 = arith.truncf %41 : vector<64x128xf32> to vector<64x128xbf16>
    %43 = vector.shape_cast %42 : vector<64x128xbf16> to vector<8x8x128xbf16>
    %cst_31 = arith.constant 0.000000e+00 : bf16
    %44 = vector.broadcast %cst_31 : bf16 to vector<1x8x128xbf16>
    %cst_32 = arith.constant 0.000000e+00 : bf16
    %45 = vector.broadcast %cst_32 : bf16 to vector<8x1x128xbf16>
    %46 = vector.extract_strided_slice %43 {offsets = [0, 0, 0], sizes = [8, 7, 128], strides = [1, 1, 1]} : vector<8x8x128xbf16> to vector<8x7x128xbf16>
    %47 = tpu.concatenate %45, %46 in 1 : vector<8x1x128xbf16>, vector<8x7x128xbf16> -> vector<8x8x128xbf16>
    %48 = vector.extract_strided_slice %47 {offsets = [0, 0, 0], sizes = [7, 8, 128], strides = [1, 1, 1]} : vector<8x8x128xbf16> to vector<7x8x128xbf16>
    %c1 = arith.constant 1 : index
    %c0_33 = arith.constant 0 : index
    %c0_34 = arith.constant 0 : index
    %49 = vector.load %arg10[%c1, %c0_33, %c0_34] : memref<8x8x1152xbf16, #tpu.memory_space<vmem>>, vector<7x8x128xbf16>
    tpu.vector_store %arg10[%c1, %c0_33, %c0_34], %48 {strides = array<i32>} : memref<8x8x1152xbf16, #tpu.memory_space<vmem>>, vector<7x8x128xbf16>,
    %c0_35 = arith.constant 0 : index
    %c0_36 = arith.constant 0 : index
    %c0_37 = arith.constant 0 : index
    %50 = vector.load %arg10[%c0_35, %c0_36, %c0_37] : memref<8x8x1152xbf16, #tpu.memory_space<vmem>>, vector<1x8x128xbf16>
    tpu.vector_store %arg10[%c0_35, %c0_36, %c0_37], %44 {strides = array<i32>} : memref<8x8x1152xbf16, #tpu.memory_space<vmem>>, vector<1x8x128xbf16>,
    %51 = vector.extract_strided_slice %32 {offsets = [0, 0, 0], sizes = [7, 8, 128], strides = [1, 1, 1]} : vector<8x8x128xbf16> to vector<7x8x128xbf16>
    %c1_38 = arith.constant 1 : index
    %c0_39 = arith.constant 0 : index
    %c128_40 = arith.constant 128 : index
    %52 = vector.load %arg10[%c1_38, %c0_39, %c128_40] : memref<8x8x1152xbf16, #tpu.memory_space<vmem>>, vector<7x8x128xbf16>
    tpu.vector_store %arg10[%c1_38, %c0_39, %c128_40], %51 {strides = array<i32>} : memref<8x8x1152xbf16, #tpu.memory_space<vmem>>, vector<7x8x128xbf16>,
    %c0_41 = arith.constant 0 : index
    %c0_42 = arith.constant 0 : index
    %c128_43 = arith.constant 128 : index
    %53 = vector.load %arg10[%c0_41, %c0_42, %c128_43] : memref<8x8x1152xbf16, #tpu.memory_space<vmem>>, vector<1x8x128xbf16>
    tpu.vector_store %arg10[%c0_41, %c0_42, %c128_43], %44 {strides = array<i32>} : memref<8x8x1152xbf16, #tpu.memory_space<vmem>>, vector<1x8x128xbf16>,
    %54 = vector.extract_strided_slice %43 {offsets = [0, 0, 0], sizes = [7, 8, 128], strides = [1, 1, 1]} : vector<8x8x128xbf16> to vector<7x8x128xbf16>
    %c1_44 = arith.constant 1 : index
    %c0_45 = arith.constant 0 : index
    %c256 = arith.constant 256 : index
    %55 = vector.load %arg10[%c1_44, %c0_45, %c256] : memref<8x8x1152xbf16, #tpu.memory_space<vmem>>, vector<7x8x128xbf16>
    tpu.vector_store %arg10[%c1_44, %c0_45, %c256], %54 {strides = array<i32>} : memref<8x8x1152xbf16, #tpu.memory_space<vmem>>, vector<7x8x128xbf16>,
    %c0_46 = arith.constant 0 : index
    %c0_47 = arith.constant 0 : index
    %c256_48 = arith.constant 256 : index
    %56 = vector.load %arg10[%c0_46, %c0_47, %c256_48] : memref<8x8x1152xbf16, #tpu.memory_space<vmem>>, vector<1x8x128xbf16>
    tpu.vector_store %arg10[%c0_46, %c0_47, %c256_48], %44 {strides = array<i32>} : memref<8x8x1152xbf16, #tpu.memory_space<vmem>>, vector<1x8x128xbf16>,
    %cst_49 = arith.constant 0.000000e+00 : bf16
    %57 = vector.broadcast %cst_49 : bf16 to vector<8x1x128xbf16>
    %58 = vector.extract_strided_slice %21 {offsets = [0, 0, 0], sizes = [8, 7, 128], strides = [1, 1, 1]} : vector<8x8x128xbf16> to vector<8x7x128xbf16>
    %59 = tpu.concatenate %57, %58 in 1 : vector<8x1x128xbf16>, vector<8x7x128xbf16> -> vector<8x8x128xbf16>
    %c0_50 = arith.constant 0 : index
    %c0_51 = arith.constant 0 : index
    %c384 = arith.constant 384 : index
    %60 = vector.load %arg10[%c0_50, %c0_51, %c384] : memref<8x8x1152xbf16, #tpu.memory_space<vmem>>, vector<8x8x128xbf16>
    tpu.vector_store %arg10[%c0_50, %c0_51, %c384], %59 {strides = array<i32>} : memref<8x8x1152xbf16, #tpu.memory_space<vmem>>, vector<8x8x128xbf16>,
    %c0_52 = arith.constant 0 : index
    %c0_53 = arith.constant 0 : index
    %c512 = arith.constant 512 : index
    %61 = vector.load %arg10[%c0_52, %c0_53, %c512] : memref<8x8x1152xbf16, #tpu.memory_space<vmem>>, vector<8x8x128xbf16>
    tpu.vector_store %arg10[%c0_52, %c0_53, %c512], %10 {strides = array<i32>} : memref<8x8x1152xbf16, #tpu.memory_space<vmem>>, vector<8x8x128xbf16>,
    %c0_54 = arith.constant 0 : index
    %c0_55 = arith.constant 0 : index
    %c640 = arith.constant 640 : index
    %62 = vector.load %arg10[%c0_54, %c0_55, %c640] : memref<8x8x1152xbf16, #tpu.memory_space<vmem>>, vector<8x8x128xbf16>
    tpu.vector_store %arg10[%c0_54, %c0_55, %c640], %21 {strides = array<i32>} : memref<8x8x1152xbf16, #tpu.memory_space<vmem>>, vector<8x8x128xbf16>,
    %c0_56 = arith.constant 0 : index
    %c0_57 = arith.constant 0 : index
    %c768 = arith.constant 768 : index
    %63 = vector.load %arg10[%c0_56, %c0_57, %c768] : memref<8x8x1152xbf16, #tpu.memory_space<vmem>>, vector<8x8x128xbf16>
    tpu.vector_store %arg10[%c0_56, %c0_57, %c768], %47 {strides = array<i32>} : memref<8x8x1152xbf16, #tpu.memory_space<vmem>>, vector<8x8x128xbf16>,
    %c0_58 = arith.constant 0 : index
    %c0_59 = arith.constant 0 : index
    %c896 = arith.constant 896 : index
    %64 = vector.load %arg10[%c0_58, %c0_59, %c896] : memref<8x8x1152xbf16, #tpu.memory_space<vmem>>, vector<8x8x128xbf16>
    tpu.vector_store %arg10[%c0_58, %c0_59, %c896], %32 {strides = array<i32>} : memref<8x8x1152xbf16, #tpu.memory_space<vmem>>, vector<8x8x128xbf16>,
    %c0_60 = arith.constant 0 : index
    %c0_61 = arith.constant 0 : index
    %c1024 = arith.constant 1024 : index
    %65 = vector.load %arg10[%c0_60, %c0_61, %c1024] : memref<8x8x1152xbf16, #tpu.memory_space<vmem>>, vector<8x8x128xbf16>
    tpu.vector_store %arg10[%c0_60, %c0_61, %c1024], %43 {strides = array<i32>} : memref<8x8x1152xbf16, #tpu.memory_space<vmem>>, vector<8x8x128xbf16>,
    %c0_62 = arith.constant 0 : index
    %c0_63 = arith.constant 0 : index
    %c0_64 = arith.constant 0 : index
    %66 = vector.load %arg10[%c0_62, %c0_63, %c0_64] : memref<8x8x1152xbf16, #tpu.memory_space<vmem>>, vector<8x8x1152xbf16>
    %67 = vector.shape_cast %66 : vector<8x8x1152xbf16> to vector<64x1152xbf16>
    %c0_65 = arith.constant 0 : index
    %c0_66 = arith.constant 0 : index
    %68 = vector.load %arg4[%c0_65, %c0_66] : memref<1152x128xbf16, #tpu.memory_space<vmem>>, vector<1152x128xbf16>
    %cst_67 = arith.constant dense<0.000000e+00> : vector<64x128xf32>
    %69 = tpu.matmul %67, %68, %cst_67 {dimension_numbers = #tpu.dot_dimension_numbers<[1], [0], [0], [1], [0, 0, 1, 1], [], []>} : vector<64x1152xbf16>, vector<1152x128xbf16>, vector<64x128xf32> -> vector<64x128xf32>
    %c0_68 = arith.constant 0 : index
    %c0_69 = arith.constant 0 : index
    %70 = vector.load %arg5[%c0_68, %c0_69] : memref<1x128xf32, #tpu.memory_space<vmem>>, vector<1x128xf32>
    %71 = vector.broadcast %70 : vector<1x128xf32> to vector<64x128xf32>
    %72 = arith.addf %69, %71 : vector<64x128xf32>
    %cst_70 = arith.constant 0.000000e+00 : f32
    %73 = vector.broadcast %cst_70 : f32 to vector<64x128xf32>
    %74 = arith.maximumf %72, %73 : vector<64x128xf32>
    %75 = arith.truncf %74 : vector<64x128xf32> to vector<64x128xbf16>
    %c0_71 = arith.constant 0 : index
    %c0_72 = arith.constant 0 : index
    %76 = vector.load %arg6[%c0_71, %c0_72] : memref<128x128xbf16, #tpu.memory_space<vmem>>, vector<128x128xbf16>
    %cst_73 = arith.constant dense<0.000000e+00> : vector<64x128xf32>
    %77 = tpu.matmul %75, %76, %cst_73 {dimension_numbers = #tpu.dot_dimension_numbers<[1], [0], [0], [1], [0, 0, 1, 1], [], []>} : vector<64x128xbf16>, vector<128x128xbf16>, vector<64x128xf32> -> vector<64x128xf32>
    %c0_74 = arith.constant 0 : index
    %c0_75 = arith.constant 0 : index
    %c0_76 = arith.constant 0 : index
    %78 = vector.load %arg1[%c0_74, %c0_75, %c0_76] : memref<1x256x128xbf16, #tpu.memory_space<vmem>>, vector<1x64x128xbf16>
    %79 = vector.shape_cast %78 : vector<1x64x128xbf16> to vector<64x128xbf16>
    %c0_77 = arith.constant 0 : index
    %c0_78 = arith.constant 0 : index
    %80 = vector.load %arg8[%c0_77, %c0_78] : memref<128x128xbf16, #tpu.memory_space<vmem>>, vector<128x128xbf16>
    %cst_79 = arith.constant dense<0.000000e+00> : vector<64x128xf32>
    %81 = tpu.matmul %79, %80, %cst_79 {dimension_numbers = #tpu.dot_dimension_numbers<[1], [0], [0], [1], [0, 0, 1, 1], [], []>} : vector<64x128xbf16>, vector<128x128xbf16>, vector<64x128xf32> -> vector<64x128xf32>
    %82 = arith.addf %77, %81 : vector<64x128xf32>
    %c0_80 = arith.constant 0 : index
    %c0_81 = arith.constant 0 : index
    %83 = vector.load %arg7[%c0_80, %c0_81] : memref<1x128xf32, #tpu.memory_space<vmem>>, vector<1x128xf32>
    %84 = vector.broadcast %83 : vector<1x128xf32> to vector<64x128xf32>
    %85 = arith.addf %82, %84 : vector<64x128xf32>
    %cst_82 = arith.constant 0.000000e+00 : f32
    %86 = vector.broadcast %cst_82 : f32 to vector<64x128xf32>
    %87 = arith.maximumf %85, %86 : vector<64x128xf32>
    %88 = arith.truncf %87 : vector<64x128xf32> to vector<64x128xbf16>
    %c0_83 = arith.constant 0 : index
    %c0_84 = arith.constant 0 : index
    %c0_85 = arith.constant 0 : index
    %89 = vector.load %arg9[%c0_83, %c0_84, %c0_85] : memref<1x64x128xbf16, #tpu.memory_space<vmem>>, vector<1x64x128xbf16>
    %90 = vector.shape_cast %89 : vector<1x64x128xbf16> to vector<64x128xbf16>
    %91 = vector.shape_cast %88 : vector<64x128xbf16> to vector<1x64x128xbf16>
    tpu.vector_store %arg9[%c0_83, %c0_84, %c0_85], %91 {strides = array<i32>} : memref<1x64x128xbf16, #tpu.memory_space<vmem>>, vector<1x64x128xbf16>,
    return
  }
  func.func @transform_0(%arg0: i32) -> (i32, i32, i32) {
    %c0_i32 = arith.constant 0 : i32
    %c0_i32_0 = arith.constant 0 : i32
    %c0_i32_1 = arith.constant 0 : i32
    return %arg0, %c0_i32, %c0_i32_0 : i32, i32, i32
  }
  func.func @transform_1(%arg0: i32) -> (i32, i32) {
    %c0_i32 = arith.constant 0 : i32
    %c0_i32_0 = arith.constant 0 : i32
    %c0_i32_1 = arith.constant 0 : i32
    return %c0_i32, %c0_i32_0 : i32, i32
  }
  func.func @transform_2(%arg0: i32) -> (i32, i32) {
    %c0_i32 = arith.constant 0 : i32
    %c0_i32_0 = arith.constant 0 : i32
    %c0_i32_1 = arith.constant 0 : i32
    return %c0_i32, %c0_i32_0 : i32, i32
  }
  func.func @transform_3(%arg0: i32) -> (i32, i32) {
    %c0_i32 = arith.constant 0 : i32
    %c0_i32_0 = arith.constant 0 : i32
    %c0_i32_1 = arith.constant 0 : i32
    return %c0_i32, %c0_i32_0 : i32, i32
  }
  func.func @transform_4(%arg0: i32) -> (i32, i32) {
    %c0_i32 = arith.constant 0 : i32
    %c0_i32_0 = arith.constant 0 : i32
    %c0_i32_1 = arith.constant 0 : i32
    return %c0_i32, %c0_i32_0 : i32, i32
  }
  func.func @transform_5(%arg0: i32) -> (i32, i32) {
    %c0_i32 = arith.constant 0 : i32
    %c0_i32_0 = arith.constant 0 : i32
    %c0_i32_1 = arith.constant 0 : i32
    return %c0_i32, %c0_i32_0 : i32, i32
  }
  func.func @transform_6(%arg0: i32) -> (i32, i32) {
    %c0_i32 = arith.constant 0 : i32
    %c0_i32_0 = arith.constant 0 : i32
    %c0_i32_1 = arith.constant 0 : i32
    return %c0_i32, %c0_i32_0 : i32, i32
  }
  func.func @transform_7(%arg0: i32) -> (i32, i32) {
    %c0_i32 = arith.constant 0 : i32
    %c0_i32_0 = arith.constant 0 : i32
    %c0_i32_1 = arith.constant 0 : i32
    return %c0_i32, %c0_i32_0 : i32, i32
  }
  func.func @transform_8(%arg0: i32) -> (i32, i32, i32) {
    %c0_i32 = arith.constant 0 : i32
    %c0_i32_0 = arith.constant 0 : i32
    %c0_i32_1 = arith.constant 0 : i32
    return %arg0, %c0_i32, %c0_i32_0 : i32, i32, i32
  }
}

</mosaic_0001>

<bundles_post_ra>
// kernel: bottleneck_forward.1
= control target key start
LH: loop header
LB: loop body
LE: loop exit
PB: predicated region body
PF: predicated region fallthrough
CT: control target
= control target key end

     0   :  { %s3628_s27 = smov 0   ;;  %s4125_s0 = inlined_call_operand.vmem [shape: bf16[2,256,128], index: 0, kind: input, shape index: {}]   ;;  %s4126_s1 = inlined_call_operand.vmem [shape: bf16[128,128], index: 1, kind: input, shape index: {}]   ;;  %s4127_s2 = inlined_call_operand.vmem [shape: f32[1,128], index: 2, kind: input, shape index: {}]   ;;  %s4128_s3 = inlined_call_operand.vmem [shape: bf16[1152,128], index: 3, kind: input, shape index: {}]   ;;  %s4129_s4 = inlined_call_operand.vmem [shape: f32[1,128], index: 4, kind: input, shape index: {}]   ;;  %s4130_s5 = inlined_call_operand.vmem [shape: bf16[128,128], index: 5, kind: input, shape index: {}]   ;;  %s4131_s6 = inlined_call_operand.vmem [shape: f32[1,128], index: 6, kind: input, shape index: {}]   ;;  %s4132_s7 = inlined_call_operand.vmem [shape: bf16[128,128], index: 7, kind: input, shape index: {}]   ;;  %s4133_s8 = inlined_call_operand.vmem [shape: bf16[2,64,128], index: 8, kind: output, shape index: {}]  }
   0x1 LB: > { %s2698_s28 = sadd.s32 4294967295, %s3580_s27   ;;  %p2702_p0 = scmp.ge.s32.totalorder %s3580_s27, 1  ;;  %s3580_s27 = sphi %s3628_s27, %s18_s27  }
   0x2   : > { %p262_p1 = scmp.lt.s32.totalorder %s3580_s27, 3 }
   0x4   : > { %p263_p2 = pnand %p2702_p0, %p262_p1 }
   0x6   : > { %266 = sbr.rel (%p263_p2) target bundleno = 783 (0x30f), region = 52 }
   0xb   : > { %v3406_v0 = vld [vmem:[%s4126_s1 + $0x38] sm:$0xff]   ;;  %p296_p3 = scmp.lt.s32.totalorder %s2698_s28, 1  ;;  %v3407_v1 = vld [vmem:[%s4126_s1 + $0x30] sm:$0xff]   ;;  %v3408_v2 = vld [vmem:[%s4126_s1 + $0x28] sm:$0xff]   ;;  %v3582_v24 = vmov 0   ;;  %vm990_vm0 = vcmask 1040384  }
   0xc   : > { %3213 = vmatprep.subr.bf16.mxu0 %v3406_v0  ;;  %3237 = vmatprep.subr.bf16.mxu1 %v3406_v0  ;;  %v3656_v3 = vld [vmem:[%s4126_s1 + $0x20] sm:$0xff]   ;;  %v3410_v6 = vld [vmem:[%s4126_s1 + $0x18] sm:$0xff]   ;;  %v3411_v7 = vld [vmem:[%s4126_s1 + $0x10] sm:$0xff]   ;;  %1025 = vst [vmem:[#allocation2 + $0x8] sm:$0xf] %v3582_v24 }
   0xd   : > { %s4155_s28 = smov (!%p296_p3, %s2698_s28), 1  ;;  %3214 = vmatpush3.bf16.msra.mxu0 %v3406_v0  ;;  %3238 = vmatpush3.bf16.msra.mxu1 %v3406_v0  ;;  %v3412_v8 = vld [vmem:[%s4126_s1 + $0x8] sm:$0xff]   ;;  %v3413_v9 = vld [vmem:[%s4126_s1] sm:$0xff]   ;;  %1009 = vst [vmem:[#allocation2] sm:$0xf] %v3582_v24  ;;  %v3430_v25 = vld [vmem:[%s4128_s3 + $0xf8] sm:$0xff]  }
   0xe   : > { %3215 = vmatprep.subr.bf16.mxu0 %v3407_v1  ;;  %3239 = vmatprep.subr.bf16.mxu1 %v3407_v1  ;;  %s2904_s13 = sshll.u32 %s4155_s28, 7  ;;  %1017 = vst [vmem:[#allocation2 + $0x4] sm:$0xf] %v3582_v24  ;;  %v3431_v26 = vld [vmem:[%s4128_s3 + $0xb8] sm:$0xff]   ;;  %v3432_v27 = vld [vmem:[%s4128_s3 + $0xf0] sm:$0xff]   ;;  %v3436_v31 = vld [vmem:[%s4128_s3 + $0xe8] sm:$0xff]  }
   0xf   : > { %s3651_s16 = scalar_lea.vmem %s4125_s0, %s2904_s13  ;;  %v3433_v28 = vld [vmem:[%s4128_s3 + $0xb0] sm:$0xff]   ;;  %v3434_v29 = vld [vmem:[%s4128_s3 + $0x78] sm:$0xff]   ;;  %v3437_v32 = vld [vmem:[%s4128_s3 + $0xa8] sm:$0xff]   ;;  %vm991_vm1 = vsmask.f32 256  ;;  %s2905_s18 = sshll.u32 %s4155_s28, 5 }
  0x10   : > { %v3414_v4 = vld [vmem:[%s3651_s16] sm:$0xff]   ;;  %v3416_v10 = vld [vmem:[%s3651_s16 + $0x8] sm:$0xff]   ;;  %v3418_v12 = vld [vmem:[%s3651_s16 + $0x30] sm:$0xff]   ;;  %s305_s21 = scalar_lea.vmem %s4133_s8, %s2905_s18 }
  0x11   : > { %3216 = vmatpush3.bf16.msra.mxu0 %v3407_v1  ;;  %3240 = vmatpush3.bf16.msra.mxu1 %v3407_v1  ;;  %v3415_v5 = vld [vmem:[%s3651_s16 + $0x20] sm:$0xff]   ;;  %v3417_v11 = vld [vmem:[%s3651_s16 + $0x28] sm:$0xff]   ;;  %v3420_v13 = vld [vmem:[%s3651_s16 + $0x10] sm:$0xff]  }
  0x12   : > { %3217 = vmatprep.subr.bf16.mxu0 %v3408_v2  ;;  %3241 = vmatprep.subr.bf16.mxu1 %v3408_v2  ;;  %v3419_v14 = vld [vmem:[%s3651_s16 + $0x38] sm:$0xff]   ;;  %v3422_v16 = vld [vmem:[%s3651_s16 + $0x60] sm:$0xff]   ;;  %v3424_v18 = vld [vmem:[%s3651_s16 + $0x68] sm:$0xff]  }
  0x13   : > { %3229 = vmatprep.mubr.bf16.mxu0 %v3414_v4  ;;  %3253 = vmatprep.mubr.bf16.mxu1 %v3415_v5  ;;  %v3421_v15 = vld [vmem:[%s3651_s16 + $0x18] sm:$0xff]   ;;  %v3423_v17 = vld [vmem:[%s3651_s16 + $0x40] sm:$0xff]   ;;  %v3425_v19 = vld [vmem:[%s3651_s16 + $0x48] sm:$0xff]  }
  0x14   : > { %v3426_v20 = vld [vmem:[%s3651_s16 + $0x70] sm:$0xff]   ;;  %v3427_v22 = vld [vmem:[%s3651_s16 + $0x78] sm:$0xff]   ;;  %v3440_v35 = vld [vmem:[%s4128_s3 + $0xe0] sm:$0xff]  }
  0x15   : > { %3218 = vmatpush3.bf16.msra.mxu0 %v3408_v2  ;;  %3242 = vmatpush3.bf16.msra.mxu1 %v3408_v2  ;;  %v3428_v21 = vld [vmem:[%s3651_s16 + $0x50] sm:$0xff]   ;;  %v3429_v23 = vld [vmem:[%s3651_s16 + $0x58] sm:$0xff]   ;;  %v3441_v36 = vld [vmem:[%s4128_s3 + $0xa0] sm:$0xff]  }
  0x16   : > { %3219 = vmatprep.subr.bf16.mxu0 %v3656_v3  ;;  %3243 = vmatprep.subr.bf16.mxu1 %v3656_v3  ;;  %v3435_v30 = vld [vmem:[%s4128_s3 + $0x38] sm:$0xff]   ;;  %v3438_v33 = vld [vmem:[%s4128_s3 + $0x70] sm:$0xff]   ;;  %v3442_v37 = vld [vmem:[%s4128_s3 + $0x68] sm:$0xff]  }
  0x17   : > { %v3439_v34 = vld [vmem:[%s4128_s3 + $0x30] sm:$0xff]   ;;  %v3443_v38 = vld [vmem:[%s4128_s3 + $0x28] sm:$0xff]   ;;  %v3444_v39 = vld [vmem:[%s4128_s3 + $0xd8] sm:$0xff]  }
  0x18   : > { %v3445_v40 = vld [vmem:[%s4128_s3 + $0x98] sm:$0xff]   ;;  %v3446_v41 = vld [vmem:[%s4128_s3 + $0x60] sm:$0xff]   ;;  %v3448_v43 = vld [vmem:[%s4128_s3 + $0xd0] sm:$0xff]  }
  0x19   : > { %3220 = vmatpush3.bf16.msra.mxu0 %v3656_v3  ;;  %3244 = vmatpush3.bf16.msra.mxu1 %v3656_v3  ;;  %v3447_v42 = vld [vmem:[%s4128_s3 + $0x20] sm:$0xff]   ;;  %v3449_v44 = vld [vmem:[%s4128_s3 + $0x90] sm:$0xff]   ;;  %v3450_v45 = vld [vmem:[%s4128_s3 + $0x58] sm:$0xff]  }
  0x1a   : > { %3221 = vmatprep.subr.bf16.mxu0 %v3410_v6  ;;  %3245 = vmatprep.subr.bf16.mxu1 %v3410_v6  ;;  %v3451_v46 = vld [vmem:[%s4128_s3 + $0x18] sm:$0xff]   ;;  %v3452_v47 = vld [vmem:[%s4128_s3 + $0xc8] sm:$0xff]   ;;  %v3454_v49 = vld [vmem:[%s4128_s3 + $0x50] sm:$0xff]  }
  0x1b   : > { %v3453_v48 = vld [vmem:[%s4128_s3 + $0x88] sm:$0xff]   ;;  %v3455_v50 = vld [vmem:[%s4128_s3 + $0x10] sm:$0xff]   ;;  %v3456_v51 = vld [vmem:[%s4128_s3 + $0xc0] sm:$0xff]  }
  0x1c   : > { %v3457_v52 = vld [vmem:[%s4128_s3 + $0x80] sm:$0xff]   ;;  %v3458_v53 = vld [vmem:[%s4128_s3 + $0x48] sm:$0xff]   ;;  %v3463_v55 = vld [vmem:[%s4128_s3 + $0x1f8] sm:$0xff]  }
  0x1d   : > { %3222 = vmatpush3.bf16.msra.mxu0 %v3410_v6  ;;  %3246 = vmatpush3.bf16.msra.mxu1 %v3410_v6  ;;  %v3459_v54 = vld [vmem:[%s4128_s3 + $0x8] sm:$0xff]   ;;  %v3465_v56 = vld [vmem:[%s4128_s3 + $0x40] sm:$0xff]   ;;  %v3474_v58 = vld [vmem:[%s4128_s3 + $0x178] sm:$0xff]  }
  0x1e   : > { %3223 = vmatprep.subr.bf16.mxu0 %v3411_v7  ;;  %3247 = vmatprep.subr.bf16.mxu1 %v3411_v7  ;;  %v3466_v57 = vld [vmem:[%s4128_s3] sm:$0xff]   ;;  %vm3812_vm2 = vmand %vm990_vm0, %vm991_vm1 }
  0x1f   : > { %v3799_v59 = vld [vmem:[%s4127_s2] ss:$0 sm:$0xff] }
  0x21   : > { %3224 = vmatpush3.bf16.msra.mxu0 %v3411_v7  ;;  %3248 = vmatpush3.bf16.msra.mxu1 %v3411_v7 }
  0x22   : > { %3225 = vmatprep.subr.bf16.mxu0 %v3412_v8  ;;  %3249 = vmatprep.subr.bf16.mxu1 %v3412_v8 }
  0x25   : > { %3226 = vmatpush3.bf16.msra.mxu0 %v3412_v8  ;;  %3250 = vmatpush3.bf16.msra.mxu1 %v3412_v8 }
  0x26   : > { %3227 = vmatprep.subr.bf16.mxu0 %v3413_v9  ;;  %3251 = vmatprep.subr.bf16.mxu1 %v3413_v9 }
  0x29   : > { %3228 = vmatpush3.bf16.msra.mxu0 %v3413_v9  ;;  %3252 = vmatpush3.bf16.msra.mxu1 %v3413_v9 }
  0x2a   : > { %3285 = vmatprep.subr.bf16.mxu1 %v3406_v0  ;;  %3261 = vmatprep.subr.bf16.mxu0 %v3406_v0 }
  0x2c   : > { %3230 = vmatmul.mubr.bf16.vlgmr.msra.gmra.mxu0 %v3416_v10  ;;  %3254 = vmatmul.mubr.bf16.vlgmr.msra.gmra.mxu1 %v3417_v11 }
  0x2d   : > { %3286 = vmatpush3.bf16.msra.mxu1 %v3406_v0  ;;  %3262 = vmatpush3.bf16.msra.mxu0 %v3406_v0 }
  0x2e   : > { %3287 = vmatprep.subr.bf16.mxu1 %v3407_v1  ;;  %3263 = vmatprep.subr.bf16.mxu0 %v3407_v1 }
  0x2f   : > { %3257 = vmatprep.mubr.bf16.mxu1 %v3418_v12  ;;  %3233 = vmatprep.mubr.bf16.mxu0 %v3420_v13 }
  0x31   : > { %3288 = vmatpush3.bf16.msra.mxu1 %v3407_v1  ;;  %3264 = vmatpush3.bf16.msra.mxu0 %v3407_v1 }
  0x32   : > { %3289 = vmatprep.subr.bf16.mxu1 %v3408_v2  ;;  %3265 = vmatprep.subr.bf16.mxu0 %v3408_v2 }
  0x34   : > { %3258 = vmatmul.mubr.bf16.gmra.mxu1 %v3419_v14  ;;  %3234 = vmatmul.mubr.bf16.gmra.mxu0 %v3421_v15 }
  0x35   : > { %3290 = vmatpush3.bf16.msra.mxu1 %v3408_v2  ;;  %3266 = vmatpush3.bf16.msra.mxu0 %v3408_v2 }
  0x36   : > { %3291 = vmatprep.subr.bf16.mxu1 %v3656_v3  ;;  %3267 = vmatprep.subr.bf16.mxu0 %v3656_v3 }
  0x37   : > { %3301 = vmatprep.mubr.bf16.mxu1 %v3422_v16  ;;  %3277 = vmatprep.mubr.bf16.mxu0 %v3423_v17 }
  0x39   : > { %3292 = vmatpush3.bf16.msra.mxu1 %v3656_v3  ;;  %3268 = vmatpush3.bf16.msra.mxu0 %v3656_v3 }
  0x3a   : > { %3293 = vmatprep.subr.bf16.mxu1 %v3410_v6  ;;  %3269 = vmatprep.subr.bf16.mxu0 %v3410_v6 }
  0x3d   : > { %3294 = vmatpush3.bf16.msra.mxu1 %v3410_v6  ;;  %3270 = vmatpush3.bf16.msra.mxu0 %v3410_v6 }
  0x3e   : > { %3295 = vmatprep.subr.bf16.mxu1 %v3411_v7  ;;  %3271 = vmatprep.subr.bf16.mxu0 %v3411_v7 }
  0x41   : > { %3296 = vmatpush3.bf16.msra.mxu1 %v3411_v7  ;;  %3272 = vmatpush3.bf16.msra.mxu0 %v3411_v7 }
  0x42   : > { %3297 = vmatprep.subr.bf16.mxu1 %v3412_v8  ;;  %3273 = vmatprep.subr.bf16.mxu0 %v3412_v8 }
  0x45   : > { %3298 = vmatpush3.bf16.msra.mxu1 %v3412_v8  ;;  %3274 = vmatpush3.bf16.msra.mxu0 %v3412_v8 }
  0x46   : > { %3299 = vmatprep.subr.bf16.mxu1 %v3413_v9  ;;  %3275 = vmatprep.subr.bf16.mxu0 %v3413_v9 }
  0x49   : > { %3300 = vmatpush3.bf16.msra.mxu1 %v3413_v9  ;;  %3276 = vmatpush3.bf16.msra.mxu0 %v3413_v9 }
  0x4a   : > { %3057 = vmatprep.subr.bf16.mxu1 %v3430_v25  ;;  %3017 = vmatprep.subr.bf16.mxu0 %v3434_v29 }
  0x4c   : > { %3302 = vmatmul.mubr.bf16.vlgmr.msra.gmra.mxu1 %v3424_v18  ;;  %3278 = vmatmul.mubr.bf16.vlgmr.msra.gmra.mxu0 %v3425_v19 }
  0x4d   : > { %3305 = vmatprep.mubr.bf16.mxu1 %v3426_v20  ;;  %3281 = vmatprep.mubr.bf16.mxu0 %v3428_v21 }
  0x4e   : > { %3058 = vmatpush3.bf16.msra.mxu1 %v3431_v26  ;;  %3018 = vmatpush3.bf16.msra.mxu0 %v3435_v30  ;;  %v3489_v30 = vld [vmem:[%s4128_s3 + $0x128] sm:$0xff]  }
  0x4f   : > { %3059 = vmatprep.subr.bf16.mxu1 %v3432_v27  ;;  %3019 = vmatprep.subr.bf16.mxu0 %v3438_v33 }
  0x52   : > { %3060 = vmatpush3.bf16.msra.mxu1 %v3433_v28  ;;  %3020 = vmatpush3.bf16.msra.mxu0 %v3439_v34 }
  0x53   : > { %3061 = vmatprep.subr.bf16.mxu1 %v3436_v31  ;;  %3021 = vmatprep.subr.bf16.mxu0 %v3442_v37 }
  0x54   : > { %3306 = vmatmul.mubr.bf16.gmra.mxu1 %v3427_v22  ;;  %3282 = vmatmul.mubr.bf16.gmra.mxu0 %v3429_v23 }
  0x56   : > { %3062 = vmatpush3.bf16.msra.mxu1 %v3437_v32  ;;  %3022 = vmatpush3.bf16.msra.mxu0 %v3443_v38 }
  0x57   : > { %3063 = vmatprep.subr.bf16.mxu1 %v3440_v35  ;;  %3023 = vmatprep.subr.bf16.mxu0 %v3446_v41 }
  0x5a   : > { %3064 = vmatpush3.bf16.msra.mxu1 %v3441_v36  ;;  %3024 = vmatpush3.bf16.msra.mxu0 %v3447_v42 }
  0x5b   : > { %3065 = vmatprep.subr.bf16.mxu1 %v3444_v39  ;;  %3025 = vmatprep.subr.bf16.mxu0 %v3450_v45 }
  0x5e   : > { %3066 = vmatpush3.bf16.msra.mxu1 %v3445_v40  ;;  %3026 = vmatpush3.bf16.msra.mxu0 %v3451_v46 }
  0x5f   : > { %3067 = vmatprep.subr.bf16.mxu1 %v3448_v43  ;;  %3027 = vmatprep.subr.bf16.mxu0 %v3454_v49 }
  0x62   : > { %3068 = vmatpush3.bf16.msra.mxu1 %v3449_v44  ;;  %3028 = vmatpush3.bf16.msra.mxu0 %v3455_v50 }
  0x63   : > { %3069 = vmatprep.subr.bf16.mxu1 %v3452_v47  ;;  %3029 = vmatprep.subr.bf16.mxu0 %v3458_v53 }
  0x66   : > { %3070 = vmatpush3.bf16.msra.mxu1 %v3453_v48  ;;  %3030 = vmatpush3.bf16.msra.mxu0 %v3459_v54 }
  0x67   : > { %3071 = vmatprep.subr.bf16.mxu1 %v3456_v51  ;;  %3031 = vmatprep.subr.bf16.mxu0 %v3465_v56 }
  0x6a   : > { %3072 = vmatpush3.bf16.msra.mxu1 %v3457_v52  ;;  %3032 = vmatpush3.bf16.msra.mxu0 %v3466_v57 }
  0x6b   : > { %3137 = vmatprep.subr.bf16.mxu1 %v3463_v55  ;;  %3097 = vmatprep.subr.bf16.mxu0 %v3474_v58 }
  0xec   : > { %v3231_v60 = vpop.f32.mrf.mxu0  ;;  %v3255_v61 = vpop.f32.mrf.mxu1 }
  0xed   : > { %v453_v62 = vadd.f32 %v3231_v60, %v3799_v59  ;;  %v590_v63 = vadd.f32 %v3255_v61, %v3799_v59 }
  0xee   : > { %v444_v0 = vpop.f32.mrf.mxu0  ;;  %v581_v1 = vpop.f32.mrf.mxu1 }
  0xef   : > { %v477_v2 = vmax.f32 %v453_v62, 0.0  ;;  %v614_v3 = vmax.f32 %v590_v63, 0.0  ;;  %v445_v4 = vadd.f32 %v3799_v59, %v444_v0  ;;  %v582_v5 = vadd.f32 %v3799_v59, %v581_v1 }
  0xf0   : > { %v3232_v6 = vpop.f32.mrf.mxu0  ;;  %v3256_v7 = vpop.f32.mrf.mxu1 }
  0xf1   : > { %v2908_v8 = vpack.c.bf16 %v477_v2, %v477_v2  ;;  %v2916_v9 = vpack.c.bf16 %v614_v3, %v614_v3  ;;  %v475_v10 = vmax.f32 %v445_v4, 0.0  ;;  %v612_v11 = vmax.f32 %v582_v5, 0.0 }
  0xf2   : > { %v456_v12 = vadd.f32 %v3232_v6, %v3799_v59  ;;  %v593_v13 = vadd.f32 %v3256_v7, %v3799_v59  ;;  %v447_v14 = vpop.f32.mrf.mxu0  ;;  %v584_v15 = vpop.f32.mrf.mxu1 }
  0xf3   : > { %1108 = vst [vmem:[#allocation2 + $0x58] sm:$0xf] %v2908_v8  ;;  %v1041_v16 = vshrl.u32 %v2916_v9, 16  ;;  %v1044_v17 = vshll.u32 %v2916_v9, 16  ;;  %1116 = vst [vmem:[#allocation2 + $0x5c] sm:$0xf] %v2916_v9  ;;  %v2906_v18 = vpack.c.bf16 %v475_v10, %v475_v10  ;;  %v2914_v19 = vpack.c.bf16 %v612_v11, %v612_v11 }
  0xf4   : > { %v478_v20 = vmax.f32 %v456_v12, 0.0  ;;  %v615_v21 = vmax.f32 %v593_v13, 0.0  ;;  %v448_v22 = vadd.f32 %v3799_v59, %v447_v14  ;;  %v585_v23 = vadd.f32 %v3799_v59, %v584_v15  ;;  %v3259_v24 = vpop.f32.mrf.mxu1  ;;  %v3235_v25 = vpop.f32.mrf.mxu0 }
  0xf5   : > { %v1043_v26 = vrot.slane %v1041_v16, 7  ;;  %1106 = vst [vmem:[#allocation2 + $0x10] sm:$0xf] %v2906_v18  ;;  %v1027_v27 = vshrl.u32 %v2914_v19, 16  ;;  %v1030_v28 = vshll.u32 %v2914_v19, 16  ;;  %v606_v29 = vadd.f32 %v3259_v24, %v3799_v59 }
  0xf6   : > { %1114 = vst [vmem:[#allocation2 + $0x14] sm:$0xf] %v2914_v19  ;;  %v2909_v31 = vpack.c.bf16 %v478_v20, %v478_v20  ;;  %v2917_v32 = vpack.c.bf16 %v615_v21, %v615_v21  ;;  %v476_v33 = vmax.f32 %v448_v22, 0.0  ;;  %v613_v34 = vmax.f32 %v585_v23, 0.0  ;;  %v597_v35 = vpop.f32.mrf.mxu1  ;;  %v460_v40 = vpop.f32.mrf.mxu0 }
  0xf7   : > { %v1046_v36 = vor.u32 %v1044_v17, %v1043_v26  ;;  %v1029_v37 = vrot.slane %v1027_v27, 7  ;;  %v618_v38 = vmax.f32 %v606_v29, 0.0  ;;  %v469_v39 = vadd.f32 %v3235_v25, %v3799_v59 }
  0xf8   : > { %1109 = vst [vmem:[#allocation2 + $0x7c] sm:$0xf] %v2909_v31  ;;  %v1048_v41 = vshrl.u32 %v2917_v32, 16  ;;  %v1051_v42 = vshll.u32 %v2917_v32, 16  ;;  %1117 = vst [vmem:[#allocation2 + $0x80] sm:$0xf] %v2917_v32  ;;  %v2907_v43 = vpack.c.bf16 %v476_v33, %v476_v33  ;;  %v2915_v44 = vpack.c.bf16 %v613_v34, %v613_v34  ;;  %v3260_v45 = vpop.f32.mrf.mxu1  ;;  %v3236_v60 = vpop.f32.mrf.mxu0 }
  0xf9   : > { %v1092_v46 = vsel %vm3812_vm2, 0, %v1046_v36  ;;  %v1032_v47 = vor.u32 %v1030_v28, %v1029_v37  ;;  %v2920_v48 = vpack.c.bf16 %v618_v38, %v618_v38  ;;  %v481_v49 = vmax.f32 %v469_v39, 0.0 }
  0xfa   : > { %1100 = vst [vmem:[#allocation2 + $0x54] sm:$0xf] %v1092_v46  ;;  %v1050_v50 = vrot.slane %v1048_v41, 7  ;;  %1107 = vst [vmem:[#allocation2 + $0x34] sm:$0xf] %v2907_v43  ;;  %v1034_v51 = vshrl.u32 %v2915_v44, 16  ;;  %v598_v53 = vadd.f32 %v3799_v59, %v597_v35  ;;  %v600_v54 = vpop.f32.mrf.mxu1  ;;  %v461_v0 = vadd.f32 %v3799_v59, %v460_v40  ;;  %v463_v13 = vpop.f32.mrf.mxu0 }
  0xfb   : > { %v1037_v52 = vshll.u32 %v2915_v44, 16  ;;  %1115 = vst [vmem:[#allocation2 + $0x38] sm:$0xf] %v2915_v44  ;;  %v1090_v55 = vsel %vm3812_vm2, 0, %v1032_v47  ;;  %v1069_v56 = vshrl.u32 %v2920_v48, 16  ;;  %v1072_v57 = vshll.u32 %v2920_v48, 16 }
  0xfc   : > { %1120 = vst [vmem:[#allocation2 + $0xec] sm:$0xf] %v2920_v48  ;;  %v2912_v58 = vpack.c.bf16 %v481_v49, %v481_v49  ;;  %1098 = vst [vmem:[#allocation2 + $0xc] sm:$0xf] %v1090_v55  ;;  %v1053_v61 = vor.u32 %v1051_v42, %v1050_v50  ;;  %v1036_v62 = vrot.slane %v1034_v51, 7  ;;  %v616_v63 = vmax.f32 %v598_v53, 0.0 }
  0xfd   : > { %v1071_v1 = vrot.slane %v1069_v56, 7  ;;  %v609_v2 = vadd.f32 %v3260_v45, %v3799_v59  ;;  %v472_v3 = vadd.f32 %v3236_v60, %v3799_v59  ;;  %v601_v4 = vadd.f32 %v3799_v59, %v600_v54 }
  0xfe   : > { %1112 = vst [vmem:[#allocation2 + $0xe8] sm:$0xf] %v2912_v58  ;;  %v1093_v5 = vsel %vm3812_vm2, 0, %v1053_v61  ;;  %v1039_v6 = vor.u32 %v1037_v52, %v1036_v62  ;;  %v2918_v7 = vpack.c.bf16 %v616_v63, %v616_v63  ;;  %v479_v8 = vmax.f32 %v461_v0, 0.0 }
  0xff   : > { %1101 = vst [vmem:[#allocation2 + $0x78] sm:$0xf] %v1093_v5  ;;  %v1074_v9 = vor.u32 %v1072_v57, %v1071_v1  ;;  %v619_v10 = vmax.f32 %v609_v2, 0.0  ;;  %v482_v11 = vmax.f32 %v472_v3, 0.0  ;;  %v617_v12 = vmax.f32 %v601_v4, 0.0 }
 0x100   : > { %v1091_v14 = vsel %vm3812_vm2, 0, %v1039_v6  ;;  %v1055_v15 = vshrl.u32 %v2918_v7, 16  ;;  %v1058_v16 = vshll.u32 %v2918_v7, 16  ;;  %1118 = vst [vmem:[#allocation2 + $0xa4] sm:$0xf] %v2918_v7  ;;  %v2910_v17 = vpack.c.bf16 %v479_v8, %v479_v8 }
 0x101   : > { %1099 = vst [vmem:[#allocation2 + $0x30] sm:$0xf] %v1091_v14  ;;  %v1096_v18 = vsel %vm3812_vm2, 0, %v1074_v9  ;;  %v2921_v19 = vpack.c.bf16 %v619_v10, %v619_v10  ;;  %v2913_v20 = vpack.c.bf16 %v482_v11, %v482_v11  ;;  %v2919_v21 = vpack.c.bf16 %v617_v12, %v617_v12 }
 0x102   : > { %1104 = vst [vmem:[#allocation2 + $0xe4] sm:$0xf] %v1096_v18  ;;  %v1057_v22 = vrot.slane %v1055_v15, 7  ;;  %1110 = vst [vmem:[#allocation2 + $0xa0] sm:$0xf] %v2910_v17  ;;  %v464_v23 = vadd.f32 %v3799_v59, %v463_v13 }
 0x103   : > { %v1076_v24 = vshrl.u32 %v2921_v19, 16  ;;  %v1079_v25 = vshll.u32 %v2921_v19, 16  ;;  %1121 = vst [vmem:[#allocation2 + $0x110] sm:$0xf] %v2921_v19  ;;  %1113 = vst [vmem:[#allocation2 + $0x10c] sm:$0xf] %v2913_v20 }
 0x104   : > { %v1062_v26 = vshrl.u32 %v2919_v21, 16  ;;  %v1065_v27 = vshll.u32 %v2919_v21, 16  ;;  %1119 = vst [vmem:[#allocation2 + $0xc8] sm:$0xf] %v2919_v21  ;;  %v1060_v28 = vor.u32 %v1058_v16, %v1057_v22  ;;  %v480_v29 = vmax.f32 %v464_v23, 0.0 }
 0x105   : > { %v1078_v31 = vrot.slane %v1076_v24, 7 }
 0x106   : > { %v1064_v32 = vrot.slane %v1062_v26, 7  ;;  %v1094_v33 = vsel %vm3812_vm2, 0, %v1060_v28  ;;  %v2911_v34 = vpack.c.bf16 %v480_v29, %v480_v29 }
 0x107   : > { %1102 = vst [vmem:[#allocation2 + $0x9c] sm:$0xf] %v1094_v33  ;;  %v1081_v35 = vor.u32 %v1079_v25, %v1078_v31 }
 0x108   : > { %v1067_v36 = vor.u32 %v1065_v27, %v1064_v32  ;;  %1111 = vst [vmem:[#allocation2 + $0xc4] sm:$0xf] %v2911_v34 }
 0x109   : > { %v1097_v37 = vsel %vm3812_vm2, 0, %v1081_v35 }
 0x10a   : > { %v1095_v38 = vsel %vm3812_vm2, 0, %v1067_v36  ;;  %1105 = vst [vmem:[#allocation2 + $0x108] sm:$0xf] %v1097_v37 }
 0x10b   : > { %1103 = vst [vmem:[#allocation2 + $0xc0] sm:$0xf] %v1095_v38 }
 0x10c   : > { %v3303_v39 = vpop.f32.mrf.mxu1  ;;  %v3279_v40 = vpop.f32.mrf.mxu0 }
 0x10d   : > { %v864_v41 = vadd.f32 %v3303_v39, %v3799_v59  ;;  %v727_v42 = vadd.f32 %v3279_v40, %v3799_v59 }
 0x10e   : > { %v855_v43 = vpop.f32.mrf.mxu1  ;;  %v718_v44 = vpop.f32.mrf.mxu0 }
 0x10f   : > { %v888_v45 = vmax.f32 %v864_v41, 0.0  ;;  %v751_v46 = vmax.f32 %v727_v42, 0.0  ;;  %v856_v47 = vadd.f32 %v3799_v59, %v855_v43  ;;  %v719_v48 = vadd.f32 %v3799_v59, %v718_v44 }
 0x110   : > { %v3304_v49 = vpop.f32.mrf.mxu1  ;;  %v3280_v50 = vpop.f32.mrf.mxu0 }
 0x111   : > { %v2932_v51 = vpack.c.bf16 %v888_v45, %v888_v45  ;;  %v2924_v52 = vpack.c.bf16 %v751_v46, %v751_v46  ;;  %v886_v53 = vmax.f32 %v856_v47, 0.0  ;;  %v749_v54 = vmax.f32 %v719_v48, 0.0 }
 0x112   : > { %v867_v55 = vadd.f32 %v3304_v49, %v3799_v59  ;;  %v730_v56 = vadd.f32 %v3280_v50, %v3799_v59  ;;  %v858_v57 = vpop.f32.mrf.mxu1  ;;  %v721_v58 = vpop.f32.mrf.mxu0  ;;  %v3462_v49 = vld [vmem:[#allocation2 + $0xc] ss:$36 sps:$4 sm:$0xff]   ;;  %v3464_v50 = vld [vmem:[%s4128_s3 + $0x1b8] sm:$0xff]  }
 0x113   : > { %v941_v60 = vshrl.u32 %v2932_v51, 16  ;;  %v944_v61 = vshll.u32 %v2932_v51, 16  ;;  %1020 = vst [vmem:[#allocation2 + $0x74] sm:$0xf] %v2932_v51  ;;  %1140 = vst [vmem:[#allocation2 + $0x68] sm:$0xf] %v2932_v51  ;;  %v2930_v62 = vpack.c.bf16 %v886_v53, %v886_v53  ;;  %v2922_v63 = vpack.c.bf16 %v749_v54, %v749_v54  ;;  %2050 = vmatprep.mubr.bf16.mxu1 %v3462_v49 }
 0x114   : > { %1012 = vst [vmem:[#allocation2 + $0x70] sm:$0xf] %v2924_v52  ;;  %1132 = vst [vmem:[#allocation2 + $0x64] sm:$0xf] %v2924_v52  ;;  %v889_v0 = vmax.f32 %v867_v55, 0.0  ;;  %v752_v1 = vmax.f32 %v730_v56, 0.0  ;;  %v859_v2 = vadd.f32 %v3799_v59, %v858_v57  ;;  %v722_v3 = vadd.f32 %v3799_v59, %v721_v58  ;;  %v3307_v4 = vpop.f32.mrf.mxu1  ;;  %v3283_v5 = vpop.f32.mrf.mxu0 }
 0x115   : > { %v943_v6 = vrot.slane %v941_v60, 7  ;;  %v927_v7 = vshrl.u32 %v2930_v62, 16  ;;  %v930_v8 = vshll.u32 %v2930_v62, 16  ;;  %1018 = vst [vmem:[#allocation2 + $0x2c] sm:$0xf] %v2930_v62  ;;  %v880_v9 = vadd.f32 %v3307_v4, %v3799_v59  ;;  %v3469_v55 = vld [vmem:[%s4128_s3 + $0x1f0] sm:$0xff]  }
 0x116   : > { %1138 = vst [vmem:[#allocation2 + $0x20] sm:$0xf] %v2930_v62  ;;  %1010 = vst [vmem:[#allocation2 + $0x28] sm:$0xf] %v2922_v63  ;;  %v2933_v10 = vpack.c.bf16 %v889_v0, %v889_v0  ;;  %v2925_v11 = vpack.c.bf16 %v752_v1, %v752_v1  ;;  %v887_v12 = vmax.f32 %v859_v2, 0.0  ;;  %v750_v13 = vmax.f32 %v722_v3, 0.0  ;;  %v871_v14 = vpop.f32.mrf.mxu1  ;;  %v734_v24 = vpop.f32.mrf.mxu0 }
 0x117   : > { %1130 = vst [vmem:[#allocation2 + $0x1c] sm:$0xf] %v2922_v63  ;;  %v946_v15 = vor.u32 %v944_v61, %v943_v6  ;;  %v929_v16 = vrot.slane %v927_v7, 7  ;;  %v892_v17 = vmax.f32 %v880_v9, 0.0  ;;  %v872_v18 = vadd.f32 %v3799_v59, %v871_v14  ;;  %v3470_v2 = vld [vmem:[%s4128_s3 + $0x1b0] sm:$0xff]   ;;  %v3503_v49 = vld [vmem:[%s4128_s3 + $0x118] sm:$0xff]  }
 0x118   : > { %v948_v19 = vshrl.u32 %v2933_v10, 16  ;;  %v951_v20 = vshll.u32 %v2933_v10, 16  ;;  %1021 = vst [vmem:[#allocation2 + $0x98] sm:$0xf] %v2933_v10  ;;  %1141 = vst [vmem:[#allocation2 + $0x8c] sm:$0xf] %v2933_v10  ;;  %v2931_v21 = vpack.c.bf16 %v887_v12, %v887_v12  ;;  %v2923_v22 = vpack.c.bf16 %v750_v13, %v750_v13  ;;  %v3308_v23 = vpop.f32.mrf.mxu1  ;;  %v3284_v43 = vpop.f32.mrf.mxu0 }
 0x119   : > { %1013 = vst [vmem:[#allocation2 + $0x94] sm:$0xf] %v2925_v11  ;;  %1133 = vst [vmem:[#allocation2 + $0x88] sm:$0xf] %v2925_v11  ;;  %v995_v25 = vsel %vm3812_vm2, 0, %v946_v15  ;;  %v932_v26 = vor.u32 %v930_v8, %v929_v16  ;;  %v2936_v27 = vpack.c.bf16 %v892_v17, %v892_v17  ;;  %v890_v28 = vmax.f32 %v872_v18, 0.0 }
 0x11a   : > { %1004 = vst [vmem:[#allocation2 + $0x6c] sm:$0xf] %v995_v25  ;;  %1124 = vst [vmem:[#allocation2 + $0x60] sm:$0xf] %v995_v25  ;;  %v950_v29 = vrot.slane %v948_v19, 7  ;;  %v934_v31 = vshrl.u32 %v2931_v21, 16  ;;  %v883_v33 = vadd.f32 %v3308_v23, %v3799_v59  ;;  %v874_v34 = vpop.f32.mrf.mxu1  ;;  %v743_v48 = vadd.f32 %v3283_v5, %v3799_v59  ;;  %v737_v1 = vpop.f32.mrf.mxu0 }
 0x11b   : > { %v937_v32 = vshll.u32 %v2931_v21, 16  ;;  %1019 = vst [vmem:[#allocation2 + $0x50] sm:$0xf] %v2931_v21  ;;  %1139 = vst [vmem:[#allocation2 + $0x44] sm:$0xf] %v2931_v21  ;;  %v993_v35 = vsel %vm3812_vm2, 0, %v932_v26  ;;  %v2934_v38 = vpack.c.bf16 %v890_v28, %v890_v28  ;;  %v875_v42 = vadd.f32 %v3799_v59, %v874_v34 }
 0x11c   : > { %1011 = vst [vmem:[#allocation2 + $0x4c] sm:$0xf] %v2923_v22  ;;  %1131 = vst [vmem:[#allocation2 + $0x40] sm:$0xf] %v2923_v22  ;;  %v969_v36 = vshrl.u32 %v2936_v27, 16  ;;  %v972_v37 = vshll.u32 %v2936_v27, 16  ;;  %v953_v39 = vor.u32 %v951_v20, %v950_v29  ;;  %v735_v60 = vadd.f32 %v3799_v59, %v734_v24 }
 0x11d   : > { %1024 = vst [vmem:[#allocation2 + $0x104] sm:$0xf] %v2936_v27  ;;  %1144 = vst [vmem:[#allocation2 + $0xf8] sm:$0xf] %v2936_v27  ;;  %v936_v40 = vrot.slane %v934_v31, 7  ;;  %v893_v41 = vmax.f32 %v883_v33, 0.0  ;;  %v746_v11 = vadd.f32 %v3284_v43, %v3799_v59  ;;  %v738_v16 = vadd.f32 %v3799_v59, %v737_v1 }
 0x11e   : > { %1002 = vst [vmem:[#allocation2 + $0x24] sm:$0xf] %v993_v35  ;;  %1122 = vst [vmem:[#allocation2 + $0x18] sm:$0xf] %v993_v35  ;;  %v3460_v44 = vld [vmem:[#allocation2 + $0x8] ss:$36 sps:$4 sm:$0xff]  }
 0x11f   : > { %v971_v45 = vrot.slane %v969_v36, 7  ;;  %v955_v46 = vshrl.u32 %v2934_v38, 16  ;;  %v958_v47 = vshll.u32 %v2934_v38, 16  ;;  %1022 = vst [vmem:[#allocation2 + $0xbc] sm:$0xf] %v2934_v38  ;;  %v996_v51 = vsel %vm3812_vm2, 0, %v953_v39  ;;  %2051 = vmatmul.mubr.bf16.vlgmr.msra.gmra.mxu1 %v3460_v44 }
 0x120   : > { %1142 = vst [vmem:[#allocation2 + $0xb0] sm:$0xf] %v2934_v38  ;;  %v939_v52 = vor.u32 %v937_v32, %v936_v40  ;;  %v2937_v53 = vpack.c.bf16 %v893_v41, %v893_v41  ;;  %v891_v54 = vmax.f32 %v875_v42, 0.0  ;;  %1005 = vst [vmem:[#allocation2 + $0x90] sm:$0xf] %v996_v51  ;;  %v755_v58 = vmax.f32 %v743_v48, 0.0  ;;  %3138 = vmatpush3.bf16.msra.mxu1 %v3464_v50 }
 0x121   : > { %1125 = vst [vmem:[#allocation2 + $0x84] sm:$0xf] %v996_v51  ;;  %v974_v56 = vor.u32 %v972_v37, %v971_v45  ;;  %v957_v57 = vrot.slane %v955_v46, 7  ;;  %v753_v6 = vmax.f32 %v735_v60, 0.0  ;;  %v3467_v7 = vld [vmem:[#allocation2 + $0x54] ss:$36 sps:$4 sm:$0xff]   ;;  %3139 = vmatprep.subr.bf16.mxu1 %v3469_v55 }
 0x122   : > { %v994_v61 = vsel %vm3812_vm2, 0, %v939_v52  ;;  %v976_v62 = vshrl.u32 %v2937_v53, 16  ;;  %v979_v63 = vshll.u32 %v2937_v53, 16  ;;  %1145 = vst [vmem:[#allocation2 + $0x11c] sm:$0xf] %v2937_v53  ;;  %v2935_v0 = vpack.c.bf16 %v891_v54, %v891_v54  ;;  %v3475_v12 = vld [vmem:[%s4128_s3 + $0x138] sm:$0xff]   ;;  %2058 = vmatprep.mubr.bf16.mxu1 %v3467_v7 }
 0x123   : > { %1003 = vst [vmem:[#allocation2 + $0x48] sm:$0xf] %v994_v61  ;;  %1123 = vst [vmem:[#allocation2 + $0x3c] sm:$0xf] %v994_v61  ;;  %v999_v3 = vsel %vm3812_vm2, 0, %v974_v56  ;;  %v960_v4 = vor.u32 %v958_v47, %v957_v57  ;;  %v2928_v5 = vpack.c.bf16 %v755_v58, %v755_v58  ;;  %v3477_v13 = vld [vmem:[%s4128_s3 + $0x1e8] sm:$0xff]   ;;  %v2926_v15 = vpack.c.bf16 %v753_v6, %v753_v6 }
 0x124   : > { %1008 = vst [vmem:[#allocation2 + $0xfc] sm:$0xf] %v999_v3  ;;  %1128 = vst [vmem:[#allocation2 + $0xf0] sm:$0xf] %v999_v3  ;;  %v978_v8 = vrot.slane %v976_v62, 7  ;;  %v962_v9 = vshrl.u32 %v2935_v0, 16  ;;  %3140 = vmatpush3.bf16.msra.mxu1 %v3470_v2 }
 0x125   : > { %v965_v10 = vshll.u32 %v2935_v0, 16  ;;  %1023 = vst [vmem:[#allocation2 + $0xe0] sm:$0xf] %v2935_v0  ;;  %1143 = vst [vmem:[#allocation2 + $0xd4] sm:$0xf] %v2935_v0  ;;  %v997_v14 = vsel %vm3812_vm2, 0, %v960_v4  ;;  %3141 = vmatprep.subr.bf16.mxu1 %v3477_v13 }
 0x126   : > { %1016 = vst [vmem:[#allocation2 + $0x100] sm:$0xf] %v2928_v5  ;;  %1136 = vst [vmem:[#allocation2 + $0xf4] sm:$0xf] %v2928_v5  ;;  %v3471_v17 = vld [vmem:[#allocation2] ss:$36 sps:$4 sm:$0xff]   ;;  %v981_v20 = vor.u32 %v979_v63, %v978_v8 }
 0x127   : > { %v3473_v18 = vld [vmem:[#allocation2 + $0x4] ss:$36 sps:$4 sm:$0xff]   ;;  %1006 = vst [vmem:[#allocation2 + $0xb4] sm:$0xf] %v997_v14  ;;  %1126 = vst [vmem:[#allocation2 + $0xa8] sm:$0xf] %v997_v14 }
 0x128   : > { %v3480_v19 = vld [vmem:[%s4128_s3 + $0x1a8] sm:$0xff]   ;;  %v964_v21 = vrot.slane %v962_v9, 7  ;;  %v756_v22 = vmax.f32 %v746_v11, 0.0  ;;  %v3483_v23 = vld [vmem:[%s4128_s3 + $0x170] sm:$0xff]   ;;  %1014 = vst [vmem:[#allocation2 + $0xb8] sm:$0xf] %v2926_v15  ;;  %1985 = vmatprep.mubr.bf16.mxu0 %v3473_v18 }
 0x129   : > { %1134 = vst [vmem:[#allocation2 + $0xac] sm:$0xf] %v2926_v15  ;;  %v754_v24 = vmax.f32 %v738_v16, 0.0  ;;  %v3485_v59 = vld [vmem:[%s4128_s3 + $0x1e0] sm:$0xff]   ;;  %v1000_v25 = vsel %vm3812_vm2, 0, %v981_v20  ;;  %1986 = vmatmul.mubr.bf16.vlgmr.msra.gmra.mxu0 %v3471_v17  ;;  %v3484_v32 = vld [vmem:[%s4128_s3 + $0x130] sm:$0xff]   ;;  %3142 = vmatpush3.bf16.msra.mxu1 %v3480_v19 }
 0x12a   : > { %v967_v26 = vor.u32 %v965_v10, %v964_v21  ;;  %v2929_v27 = vpack.c.bf16 %v756_v22, %v756_v22  ;;  %v3476_v28 = vld [vmem:[#allocation2 + $0x50] ss:$36 sps:$4 sm:$0xff]   ;;  %1129 = vst [vmem:[#allocation2 + $0x114] sm:$0xf] %v1000_v25  ;;  %3098 = vmatpush3.bf16.msra.mxu0 %v3475_v12  ;;  %v3478_v31 = vld [vmem:[#allocation2 + $0x9c] ss:$36 sps:$4 sm:$0xff]   ;;  %3143 = vmatprep.subr.bf16.mxu1 %v3485_v59 }
 0x12b   : > { %v2927_v29 = vpack.c.bf16 %v754_v24, %v754_v24  ;;  %2059 = vmatmul.mubr.bf16.gmra.mxu1 %v3476_v28  ;;  %v3481_v34 = vld [vmem:[#allocation2 + $0x4c] ss:$36 sps:$4 sm:$0xff]   ;;  %3099 = vmatprep.subr.bf16.mxu0 %v3483_v23  ;;  %v3486_v36 = vld [vmem:[%s4128_s3 + $0x1a0] sm:$0xff]   ;;  %v3493_v37 = vld [vmem:[%s4128_s3 + $0x1d8] sm:$0xff]  }
 0x12c   : > { %v998_v33 = vsel %vm3812_vm2, 0, %v967_v26  ;;  %1137 = vst [vmem:[#allocation2 + $0x118] sm:$0xf] %v2929_v27  ;;  %v3487_v35 = vld [vmem:[%s4128_s3 + $0x168] sm:$0xff]   ;;  %2066 = vmatprep.mubr.bf16.mxu1 %v3478_v31  ;;  %1993 = vmatprep.mubr.bf16.mxu0 %v3481_v34  ;;  %v3496_v38 = vld [vmem:[%s4128_s3 + $0x198] sm:$0xff]   ;;  %v3497_v40 = vld [vmem:[%s4128_s3 + $0x160] sm:$0xff]  }
 0x12d   : > { %1007 = vst [vmem:[#allocation2 + $0xd8] sm:$0xf] %v998_v33  ;;  %1127 = vst [vmem:[#allocation2 + $0xcc] sm:$0xf] %v998_v33  ;;  %v3488_v39 = vld [vmem:[#allocation2 + $0x48] ss:$36 sps:$4 sm:$0xff]   ;;  %3144 = vmatpush3.bf16.msra.mxu1 %v3486_v36 }
 0x12e   : > { %1015 = vst [vmem:[#allocation2 + $0xdc] sm:$0xf] %v2927_v29  ;;  %1135 = vst [vmem:[#allocation2 + $0xd0] sm:$0xf] %v2927_v29  ;;  %3100 = vmatpush3.bf16.msra.mxu0 %v3484_v32  ;;  %v3492_v42 = vld [vmem:[#allocation2 + $0x98] ss:$36 sps:$4 sm:$0xff]   ;;  %3145 = vmatprep.subr.bf16.mxu1 %v3493_v37 }
 0x12f   : > { %3101 = vmatprep.subr.bf16.mxu0 %v3487_v35  ;;  %v3490_v41 = vld [vmem:[#allocation2 + $0x94] ss:$36 sps:$4 sm:$0xff]   ;;  %v3494_v44 = vld [vmem:[#allocation2 + $0xe4] ss:$36 sps:$4 sm:$0xff]   ;;  %v3511_v56 = vld [vmem:[#allocation2 + $0x1c] ss:$36 sps:$4 sm:$0xff]  }
 0x130   : > { %v3499_v43 = vld [vmem:[%s4128_s3 + $0x1d0] sm:$0xff]   ;;  %v3498_v45 = vld [vmem:[%s4128_s3 + $0x120] sm:$0xff]   ;;  %v3501_v46 = vld [vmem:[%s4128_s3 + $0x158] sm:$0xff]  }
 0x131   : > { %1994 = vmatmul.mubr.bf16.gmra.mxu0 %v3488_v39  ;;  %3146 = vmatpush3.bf16.msra.mxu1 %v3496_v38  ;;  %v3500_v47 = vld [vmem:[%s4128_s3 + $0x190] sm:$0xff]   ;;  %v3507_v48 = vld [vmem:[%s4128_s3 + $0x1c8] sm:$0xff]   ;;  %v3506_v54 = vld [vmem:[#allocation2 + $0xe0] ss:$36 sps:$4 sm:$0xff]  }
 0x132   : > { %3102 = vmatpush3.bf16.msra.mxu0 %v3489_v30  ;;  %2001 = vmatprep.mubr.bf16.mxu0 %v3490_v41  ;;  %v3502_v50 = vld [vmem:[#allocation2 + $0x90] ss:$36 sps:$4 sm:$0xff]   ;;  %v3508_v53 = vld [vmem:[%s4128_s3 + $0x188] sm:$0xff]   ;;  %v3514_v55 = vld [vmem:[%s4128_s3 + $0x1c0] sm:$0xff]  }
 0x133   : > { %2067 = vmatmul.mubr.bf16.gmra.mxu1 %v3492_v42  ;;  %3103 = vmatprep.subr.bf16.mxu0 %v3497_v40  ;;  %v3512_v51 = vld [vmem:[%s4128_s3 + $0x150] sm:$0xff]   ;;  %v3516_v58 = vld [vmem:[%s4128_s3 + $0x148] sm:$0xff]   ;;  %v3515_v60 = vld [vmem:[%s4128_s3 + $0x180] sm:$0xff]  }
 0x134   : > { %2074 = vmatprep.mubr.bf16.mxu1 %v3494_v44  ;;  %3147 = vmatprep.subr.bf16.mxu1 %v3499_v43  ;;  %v3513_v57 = vld [vmem:[%s4128_s3 + $0x110] sm:$0xff]   ;;  %v3518_v61 = vld [vmem:[%s4128_s3 + $0x108] sm:$0xff]   ;;  %v3517_v62 = vld [vmem:[#allocation2 + $0xd8] ss:$36 sps:$4 sm:$0xff]  }
 0x135   : > { %3148 = vmatpush3.bf16.msra.mxu1 %v3500_v47  ;;  %v3504_v52 = vld [vmem:[#allocation2 + $0xdc] ss:$36 sps:$4 sm:$0xff]   ;;  %v3521_v0 = vld [vmem:[#allocation2 + $0x14] ss:$36 sps:$4 sm:$0xff]   ;;  %v3522_v2 = vld [vmem:[#allocation2 + $0x64] ss:$36 sps:$4 sm:$0xff]  }
 0x136   : > { %3104 = vmatpush3.bf16.msra.mxu0 %v3498_v45  ;;  %3149 = vmatprep.subr.bf16.mxu1 %v3507_v48  ;;  %v3524_v63 = vld [vmem:[%s4128_s3 + $0x140] sm:$0xff]   ;;  %v3509_v1 = vld [vmem:[#allocation2 + $0x18] ss:$36 sps:$4 sm:$0xff]   ;;  %v3519_v5 = vld [vmem:[#allocation2 + $0x10] ss:$36 sps:$4 sm:$0xff]  }
 0x137   : > { %3105 = vmatprep.subr.bf16.mxu0 %v3501_v46  ;;  %v3525_v3 = vld [vmem:[%s4128_s3 + $0x100] sm:$0xff]   ;;  %v3526_v4 = vld [vmem:[%s4128_s3 + $0x238] sm:$0xff]   ;;  %v3532_v6 = vld [vmem:[%s4128_s3 + $0x230] sm:$0xff]  }
 0x138   : > { %v3527_v7 = vld [vmem:[#allocation2 + $0x5c] ss:$36 sps:$4 sm:$0xff]   ;;  %v3530_v9 = vld [vmem:[#allocation2 + $0xac] ss:$36 sps:$4 sm:$0xff]   ;;  %v3535_v13 = vld [vmem:[#allocation2 + $0xa4] ss:$36 sps:$4 sm:$0xff]  }
 0x139   : > { %2002 = vmatmul.mubr.bf16.gmra.mxu0 %v3502_v50  ;;  %3150 = vmatpush3.bf16.msra.mxu1 %v3508_v53  ;;  %v3529_v8 = vld [vmem:[#allocation2 + $0x60] ss:$36 sps:$4 sm:$0xff]   ;;  %v3533_v10 = vld [vmem:[%s4128_s3 + $0x228] sm:$0xff]   ;;  %v3534_v11 = vld [vmem:[#allocation2 + $0x58] ss:$36 sps:$4 sm:$0xff]  }
 0x13a   : > { %3106 = vmatpush3.bf16.msra.mxu0 %v3503_v49  ;;  %2009 = vmatprep.mubr.bf16.mxu0 %v3504_v52  ;;  %v3540_v12 = vld [vmem:[%s4128_s3 + $0x220] sm:$0xff]   ;;  %v3537_v14 = vld [vmem:[#allocation2 + $0xa8] ss:$36 sps:$4 sm:$0xff]   ;;  %v3538_v15 = vld [vmem:[#allocation2 + $0xf4] ss:$36 sps:$4 sm:$0xff]  }
 0x13b   : > { %2075 = vmatmul.mubr.bf16.gmra.mxu1 %v3506_v54  ;;  %3107 = vmatprep.subr.bf16.mxu0 %v3512_v51  ;;  %v3541_v16 = vld [vmem:[%s4128_s3 + $0x218] sm:$0xff]   ;;  %v3542_v17 = vld [vmem:[#allocation2 + $0xa0] ss:$36 sps:$4 sm:$0xff]   ;;  %v3546_v18 = vld [vmem:[%s4128_s3 + $0x210] sm:$0xff]  }
 0x13c   : > { %2180 = vmatprep.mubr.bf16.mxu1 %v3511_v56  ;;  %3151 = vmatprep.subr.bf16.mxu1 %v3514_v55  ;;  %v3543_v19 = vld [vmem:[#allocation2 + $0xec] ss:$36 sps:$4 sm:$0xff]   ;;  %v3550_v23 = vld [vmem:[%s4128_s3 + $0x200] sm:$0xff]   ;;  %v3553_v26 = vld [vmem:[#allocation2 + $0xf8] ss:$36 sps:$4 sm:$0xff]  }
 0x13d   : > { %3152 = vmatpush3.bf16.msra.mxu1 %v3515_v60  ;;  %v3545_v20 = vld [vmem:[#allocation2 + $0xf0] ss:$36 sps:$4 sm:$0xff]   ;;  %v3547_v21 = vld [vmem:[%s4128_s3 + $0x208] sm:$0xff]   ;;  %v3549_v24 = vld [vmem:[#allocation2 + $0x20] ss:$36 sps:$4 sm:$0xff]  }
 0x13e   : > { %3108 = vmatpush3.bf16.msra.mxu0 %v3513_v57  ;;  %v3548_v22 = vld [vmem:[#allocation2 + $0xe8] ss:$36 sps:$4 sm:$0xff]   ;;  %v3552_v25 = vld [vmem:[#allocation2 + $0xb0] ss:$36 sps:$4 sm:$0xff]   ;;  %v3554_v27 = vld [vmem:[%s4132_s7 + $0x38] sm:$0xff]  }
 0x13f   : > { %3109 = vmatprep.subr.bf16.mxu0 %v3516_v58  ;;  %v3551_v59 = vld [vmem:[#allocation2 + $0x68] ss:$36 sps:$4 sm:$0xff]   ;;  %3333 = vmatprep.subr.bf16.mxu1 %v3554_v27  ;;  %v3555_v28 = vld [vmem:[%s4132_s7 + $0x30] sm:$0xff]   ;;  %v3557_v31 = vld [vmem:[%s4132_s7 + $0x20] sm:$0xff]  }
 0x140   : > { %v3556_v29 = vld [vmem:[%s4132_s7 + $0x28] sm:$0xff]   ;;  %v3558_v32 = vld [vmem:[%s4132_s7 + $0x18] sm:$0xff]   ;;  %v3559_v33 = vld [vmem:[%s4132_s7 + $0x10] sm:$0xff]  }
 0x141   : > { %2010 = vmatmul.mubr.bf16.gmra.mxu0 %v3517_v62  ;;  %v3560_v34 = vld [vmem:[%s4132_s7 + $0x8] sm:$0xff]   ;;  %v3561_v35 = vld [vmem:[%s4132_s7] sm:$0xff]   ;;  %v3562_v36 = vld [vmem:[%s4130_s5 + $0x38] sm:$0xff]  }
 0x142   : > { %3110 = vmatpush3.bf16.msra.mxu0 %v3518_v61  ;;  %2115 = vmatprep.mubr.bf16.mxu0 %v3521_v0  ;;  %v3563_v30 = vld [vmem:[%s3651_s16] sm:$0xff]   ;;  %v3564_v37 = vld [vmem:[%s3651_s16 + $0x8] sm:$0xff]   ;;  %v3565_v38 = vld [vmem:[%s4130_s5 + $0x30] sm:$0xff]  }
 0x143   : > { %2181 = vmatmul.mubr.bf16.vlgmr.msra.gmra.mxu1 %v3509_v1  ;;  %3111 = vmatprep.subr.bf16.mxu0 %v3524_v63  ;;  %v3566_v39 = vld [vmem:[%s4130_s5 + $0x28] sm:$0xff]   ;;  %v3567_v40 = vld [vmem:[%s4130_s5 + $0x20] sm:$0xff]   ;;  %v3568_v41 = vld [vmem:[%s4130_s5 + $0x18] sm:$0xff]  }
 0x144   : > { %2188 = vmatprep.mubr.bf16.mxu1 %v3522_v2  ;;  %3334 = vmatpush3.bf16.msra.mxu1 %v3554_v27  ;;  %v3569_v42 = vld [vmem:[%s4130_s5 + $0x10] sm:$0xff]   ;;  %v3570_v43 = vld [vmem:[%s4130_s5 + $0x8] sm:$0xff]   ;;  %v3572_v45 = vld [vmem:[%s3651_s16 + $0x18] sm:$0xff]  }
 0x145   : > { %3335 = vmatprep.subr.bf16.mxu1 %v3555_v28  ;;  %v3571_v44 = vld [vmem:[%s3651_s16 + $0x10] sm:$0xff]   ;;  %v3573_v46 = vld [vmem:[%s4130_s5] sm:$0xff]  }
 0x146   : > { %3112 = vmatpush3.bf16.msra.mxu0 %v3525_v3 }
 0x147   : > { %3309 = vmatprep.subr.bf16.mxu0 %v3526_v4 }
 0x148   : > { %3336 = vmatpush3.bf16.msra.mxu1 %v3555_v28 }
 0x149   : > { %2116 = vmatmul.mubr.bf16.vlgmr.msra.gmra.mxu0 %v3519_v5  ;;  %3337 = vmatprep.subr.bf16.mxu1 %v3556_v29 }
 0x14a   : > { %3310 = vmatpush3.bf16.msra.mxu0 %v3526_v4  ;;  %2123 = vmatprep.mubr.bf16.mxu0 %v3527_v7 }
 0x14b   : > { %2189 = vmatmul.mubr.bf16.gmra.mxu1 %v3529_v8  ;;  %3311 = vmatprep.subr.bf16.mxu0 %v3532_v6 }
 0x14c   : > { %2196 = vmatprep.mubr.bf16.mxu1 %v3530_v9  ;;  %3338 = vmatpush3.bf16.msra.mxu1 %v3556_v29 }
 0x14d   : > { %3339 = vmatprep.subr.bf16.mxu1 %v3557_v31 }
 0x14e   : > { %3312 = vmatpush3.bf16.msra.mxu0 %v3532_v6 }
 0x14f   : > { %3313 = vmatprep.subr.bf16.mxu0 %v3533_v10 }
 0x150   : > { %3340 = vmatpush3.bf16.msra.mxu1 %v3557_v31 }
 0x151   : > { %2124 = vmatmul.mubr.bf16.gmra.mxu0 %v3534_v11  ;;  %3341 = vmatprep.subr.bf16.mxu1 %v3558_v32 }
 0x152   : > { %3314 = vmatpush3.bf16.msra.mxu0 %v3533_v10  ;;  %2131 = vmatprep.mubr.bf16.mxu0 %v3535_v13 }
 0x153   : > { %2197 = vmatmul.mubr.bf16.gmra.mxu1 %v3537_v14  ;;  %3315 = vmatprep.subr.bf16.mxu0 %v3540_v12 }
 0x154   : > { %2204 = vmatprep.mubr.bf16.mxu1 %v3538_v15  ;;  %3342 = vmatpush3.bf16.msra.mxu1 %v3558_v32 }
 0x155   : > { %3343 = vmatprep.subr.bf16.mxu1 %v3559_v33 }
 0x156   : > { %3316 = vmatpush3.bf16.msra.mxu0 %v3540_v12 }
 0x157   : > { %3317 = vmatprep.subr.bf16.mxu0 %v3541_v16 }
 0x158   : > { %3344 = vmatpush3.bf16.msra.mxu1 %v3559_v33 }
 0x159   : > { %2132 = vmatmul.mubr.bf16.gmra.mxu0 %v3542_v17  ;;  %3345 = vmatprep.subr.bf16.mxu1 %v3560_v34 }
 0x15a   : > { %3318 = vmatpush3.bf16.msra.mxu0 %v3541_v16  ;;  %2139 = vmatprep.mubr.bf16.mxu0 %v3543_v19 }
 0x15b   : > { %2205 = vmatmul.mubr.bf16.gmra.mxu1 %v3545_v20  ;;  %3319 = vmatprep.subr.bf16.mxu0 %v3546_v18 }
 0x15c   : > { %3346 = vmatpush3.bf16.msra.mxu1 %v3560_v34  ;;  %3349 = vmatprep.mubr.bf16.mxu1 %v3563_v30 }
 0x15d   : > { %3347 = vmatprep.subr.bf16.mxu1 %v3561_v35 }
 0x15e   : > { %3320 = vmatpush3.bf16.msra.mxu0 %v3546_v18 }
 0x15f   : > { %3321 = vmatprep.subr.bf16.mxu0 %v3547_v21 }
 0x160   : > { %3348 = vmatpush3.bf16.msra.mxu1 %v3561_v35 }
 0x161   : > { %2140 = vmatmul.mubr.bf16.gmra.mxu0 %v3548_v22  ;;  %3381 = vmatprep.subr.bf16.mxu1 %v3562_v36 }
 0x162   : > { %3322 = vmatpush3.bf16.msra.mxu0 %v3547_v21  ;;  %3325 = vmatprep.mubr.bf16.mxu0 %v3549_v24 }
 0x163   : > { %3323 = vmatprep.subr.bf16.mxu0 %v3550_v23  ;;  %3350 = vmatmul.mubr.bf16.vlgmr.msra.gmra.mxu1 %v3564_v37 }
 0x164   : > { %3389 = vmatpush3.bf16.msra.mxu1 %v3562_v36  ;;  %3353 = vmatprep.mubr.bf16.mxu1 %v3571_v44 }
 0x165   : > { %3382 = vmatprep.subr.bf16.mxu1 %v3565_v38 }
 0x166   : > { %3324 = vmatpush3.bf16.msra.mxu0 %v3550_v23 }
 0x167   : > { %3357 = vmatprep.subr.bf16.mxu0 %v3562_v36 }
 0x168   : > { %3390 = vmatpush3.bf16.msra.mxu1 %v3565_v38 }
 0x169   : > { %3326 = vmatmul.mubr.bf16.vlgmr.msra.gmra.mxu0 %v3551_v59  ;;  %3383 = vmatprep.subr.bf16.mxu1 %v3566_v39 }
 0x16a   : > { %3329 = vmatprep.mubr.bf16.mxu0 %v3552_v25  ;;  %3358 = vmatpush3.bf16.msra.mxu0 %v3562_v36 }
 0x16b   : > { %3359 = vmatprep.subr.bf16.mxu0 %v3565_v38  ;;  %3354 = vmatmul.mubr.bf16.gmra.mxu1 %v3572_v45 }
 0x16c   : > { %3391 = vmatpush3.bf16.msra.mxu1 %v3566_v39 }
 0x16d   : > { %3384 = vmatprep.subr.bf16.mxu1 %v3567_v40 }
 0x16e   : > { %3360 = vmatpush3.bf16.msra.mxu0 %v3565_v38 }
 0x16f   : > { %3361 = vmatprep.subr.bf16.mxu0 %v3566_v39 }
 0x170   : > { %3392 = vmatpush3.bf16.msra.mxu1 %v3567_v40 }
 0x171   : > { %3330 = vmatmul.mubr.bf16.gmra.mxu0 %v3553_v26  ;;  %3385 = vmatprep.subr.bf16.mxu1 %v3568_v41 }
 0x172   : > { %3362 = vmatpush3.bf16.msra.mxu0 %v3566_v39  ;;  %v2764_v39 = vld [vmem:[%s4129_s4] ss:$0 sm:$0xff] }
 0x173   : > { %3363 = vmatprep.subr.bf16.mxu0 %v3567_v40 }
 0x174   : > { %3393 = vmatpush3.bf16.msra.mxu1 %v3568_v41 }
 0x175   : > { %3386 = vmatprep.subr.bf16.mxu1 %v3569_v42 }
 0x176   : > { %3364 = vmatpush3.bf16.msra.mxu0 %v3567_v40 }
 0x177   : > { %3365 = vmatprep.subr.bf16.mxu0 %v3568_v41 }
 0x178   : > { %3394 = vmatpush3.bf16.msra.mxu1 %v3569_v42 }
 0x179   : > { %3387 = vmatprep.subr.bf16.mxu1 %v3570_v43 }
 0x17a   : > { %3366 = vmatpush3.bf16.msra.mxu0 %v3568_v41 }
 0x17b   : > { %3367 = vmatprep.subr.bf16.mxu0 %v3569_v42 }
 0x17c   : > { %3395 = vmatpush3.bf16.msra.mxu1 %v3570_v43 }
 0x17d   : > { %3388 = vmatprep.subr.bf16.mxu1 %v3573_v46 }
 0x17e   : > { %3368 = vmatpush3.bf16.msra.mxu0 %v3569_v42 }
 0x17f   : > { %3369 = vmatprep.subr.bf16.mxu0 %v3570_v43 }
 0x180   : > { %3396 = vmatpush3.bf16.msra.mxu1 %v3573_v46 }
 0x182   : > { %3370 = vmatpush3.bf16.msra.mxu0 %v3570_v43 }
 0x183   : > { %3371 = vmatprep.subr.bf16.mxu0 %v3573_v46 }
 0x186   : > { %3372 = vmatpush3.bf16.msra.mxu0 %v3573_v46 }
 0x1df   : > { %v4037_v47 = vpop.f32.mrf.mxu1 }
 0x1e1   : > { %v4039_v48 = vpop.f32.mrf.mxu1 }
 0x1e3   : > { %v4041_v49 = vpop.f32.mrf.mxu1 }
 0x1e5   : > { %v4043_v50 = vpop.f32.mrf.mxu1 }
 0x1e9   : > { %v3033_v51 = vpop.f32.mrf.mxu0 }
 0x1eb   : > { %v4045_v52 = vpop.f32.mrf.mxu1  ;;  %v3034_v53 = vpop.f32.mrf.mxu0 }
 0x1ec   : > { %v3035_v37 = vadd.f32 %v3034_v53, %v3033_v51  ;;  %v3078_v53 = vadd.f32 %v4043_v50, %v4041_v49 }
 0x1ed   : > { %v4047_v54 = vpop.f32.mrf.mxu1  ;;  %v3036_v55 = vpop.f32.mrf.mxu0 }
 0x1ee   : > { %v1988_v45 = vadd.f32 %v3035_v37, %v2764_v39 }
 0x1ef   : > { %v3082_v56 = vpop.f32.mrf.mxu1  ;;  %v3037_v57 = vpop.f32.mrf.mxu0 }
 0x1f0   : > { %v3038_v40 = vadd.f32 %v3037_v57, %v3036_v55 }
 0x1f1   : > { %v3083_v58 = vpop.f32.mrf.mxu1  ;;  %v3039_v60 = vpop.f32.mrf.mxu0 }
 0x1f3   : > { %v4049_v61 = vpop.f32.mrf.mxu1  ;;  %v3040_v62 = vpop.f32.mrf.mxu0 }
 0x1f4   : > { %v3041_v41 = vadd.f32 %v3040_v62, %v3039_v60  ;;  %v3081_v60 = vadd.f32 %v4047_v54, %v4045_v52 }
 0x1f5   : > { %v4051_v63 = vpop.f32.mrf.mxu1  ;;  %v3042_v0 = vpop.f32.mrf.mxu0 }
 0x1f6   : > { %v3087_v49 = vadd.f32 %v4051_v63, %v4049_v61 }
 0x1f7   : > { %v4053_v1 = vpop.f32.mrf.mxu1  ;;  %v3043_v2 = vpop.f32.mrf.mxu0 }
 0x1f8   : > { %v3044_v38 = vadd.f32 %v3043_v2, %v3042_v0  ;;  %v3084_v0 = vadd.f32 %v3083_v58, %v3082_v56 }
 0x1f9   : > { %v4055_v3 = vpop.f32.mrf.mxu1  ;;  %v3045_v4 = vpop.f32.mrf.mxu0 }
 0x1fa   : > { %v1999_v46 = vadd.f32 %v3044_v38, %v2764_v39  ;;  %v3090_v50 = vadd.f32 %v4055_v3, %v4053_v1 }
 0x1fb   : > { %v4057_v5 = vpop.f32.mrf.mxu1  ;;  %v3046_v6 = vpop.f32.mrf.mxu0 }
 0x1fc   : > { %v3047_v62 = vadd.f32 %v3046_v6, %v3045_v4 }
 0x1fd   : > { %v4059_v7 = vpop.f32.mrf.mxu1  ;;  %v3048_v8 = vpop.f32.mrf.mxu0 }
 0x1fe   : > { %v2004_v56 = vadd.f32 %v3047_v62, %v2764_v39  ;;  %v3093_v58 = vadd.f32 %v4059_v7, %v4057_v5 }
 0x1ff   : > { %v4061_v9 = vpop.f32.mrf.mxu1  ;;  %v3049_v10 = vpop.f32.mrf.mxu0 }
 0x201   : > { %v4063_v11 = vpop.f32.mrf.mxu1  ;;  %v3051_v12 = vpop.f32.mrf.mxu0 }
 0x202   : > { %v3096_v61 = vadd.f32 %v4063_v11, %v4061_v9 }
 0x203   : > { %v4065_v13 = vpop.f32.mrf.mxu1  ;;  %v3052_v14 = vpop.f32.mrf.mxu0 }
 0x205   : > { %v4067_v15 = vpop.f32.mrf.mxu1  ;;  %v3054_v16 = vpop.f32.mrf.mxu0 }
 0x207   : > { %v4069_v17 = vpop.f32.mrf.mxu1  ;;  %v3055_v18 = vpop.f32.mrf.mxu0 }
 0x208   : > { %4136 = vst [vmem:[#allocation3_spill] sm:$0xff] %v4069_v17  ;;  %v3056_v2 = vadd.f32 %v3055_v18, %v3054_v16 }
 0x209   : > { %v4071_v19 = vpop.f32.mrf.mxu1  ;;  %v3113_v20 = vpop.f32.mrf.mxu0 }
 0x20a   : > { %4137 = vst [vmem:[#allocation4_spill] sm:$0xff] %v4071_v19  ;;  %v2015_v4 = vadd.f32 %v3056_v2, %v2764_v39 }
 0x20b   : > { %v4073_v21 = vpop.f32.mrf.mxu1  ;;  %v3114_v22 = vpop.f32.mrf.mxu0 }
 0x20c   : > { %4138 = vst [vmem:[#allocation5_spill] sm:$0xff] %v4073_v21  ;;  %v3115_v55 = vadd.f32 %v3114_v22, %v3113_v20 }
 0x20d   : > { %v4075_v23 = vpop.f32.mrf.mxu1  ;;  %v3116_v24 = vpop.f32.mrf.mxu0 }
 0x20e   : > { %4139 = vst [vmem:[#allocation6_spill] sm:$0xff] %v4075_v23 }
 0x20f   : > { %v3162_v59 = vpop.f32.mrf.mxu1  ;;  %v3117_v25 = vpop.f32.mrf.mxu0  ;;  %v4145_v1 = vld [vmem:[#allocation3_spill] sm:$0xff] }
 0x211   : > { %v3163_v26 = vpop.f32.mrf.mxu1  ;;  %v3119_v27 = vpop.f32.mrf.mxu0  ;;  %v4146_v3 = vld [vmem:[#allocation4_spill] sm:$0xff] }
 0x212   : > { %v3164_v16 = vadd.f32 %v3163_v26, %v3162_v59  ;;  %v3158_v18 = vadd.f32 %v4146_v3, %v4145_v1 }
 0x213   : > { %v4077_v28 = vpop.f32.mrf.mxu1  ;;  %v3120_v29 = vpop.f32.mrf.mxu0  ;;  %v4147_v20 = vld [vmem:[#allocation5_spill] sm:$0xff] }
 0x214   : > { %4140 = vst [vmem:[#allocation7_spill] sm:$0xff] %v4077_v28  ;;  %v1996_v28 = vadd.f32 %v3041_v41, %v2764_v39  ;;  %v3121_v37 = vadd.f32 %v3120_v29, %v3119_v27  ;;  %v3053_v41 = vadd.f32 %v3052_v14, %v3051_v12  ;;  %v3155_v12 = vadd.f32 %v4067_v15, %v4065_v13 }
 0x215   : > { %v3122_v31 = vpop.f32.mrf.mxu0  ;;  %v4079_v32 = vpop.f32.mrf.mxu1  ;;  %v4148_v22 = vld [vmem:[#allocation6_spill] sm:$0xff]  ;;  %v2069_v29 = vadd.f32 %v3087_v49, %v2004_v56  ;;  %v2080_v15 = vadd.f32 %v3096_v61, %v2015_v4 }
 0x216   : > { %4141 = vst [vmem:[#allocation8_spill] sm:$0xff] %v4079_v32  ;;  %v3075_v32 = vadd.f32 %v4039_v48, %v4037_v47  ;;  %v3118_v48 = vadd.f32 %v3117_v25, %v3116_v24  ;;  %v2061_v21 = vadd.f32 %v3081_v60, %v1996_v28  ;;  %v2012_v63 = vadd.f32 %v3053_v41, %v2764_v39 }
 0x217   : > { %v3123_v33 = vpop.f32.mrf.mxu0  ;;  %v4081_v35 = vpop.f32.mrf.mxu1  ;;  %v3161_v24 = vadd.f32 %v4148_v22, %v4147_v20 }
 0x218   : > { %4142 = vst [vmem:[#allocation9_spill] sm:$0xff] %v4081_v35  ;;  %v1991_v35 = vadd.f32 %v3038_v40, %v2764_v39  ;;  %v3124_v57 = vadd.f32 %v3123_v33, %v3122_v31  ;;  %v2053_v47 = vadd.f32 %v3075_v32, %v1988_v45  ;;  %v2064_v40 = vadd.f32 %v3084_v0, %v1999_v46 }
 0x219   : > { %v3125_v34 = vpop.f32.mrf.mxu0  ;;  %v4086_v42 = vpop.f32.mrf.mxu1  ;;  %v2126_v6 = vadd.f32 %v3121_v37, %v2061_v21  ;;  %v2077_v33 = vadd.f32 %v3093_v58, %v2012_v63 }
 0x21a   : > { %4143 = vst [vmem:[#allocation10_spill] sm:$0xff] %v4086_v42  ;;  %v3050_v42 = vadd.f32 %v3049_v10, %v3048_v8  ;;  %v2118_v52 = vadd.f32 %v3115_v55, %v2053_v47  ;;  %v2129_v54 = vadd.f32 %v3124_v57, %v2064_v40 }
 0x21b   : > { %v3126_v36 = vpop.f32.mrf.mxu0  ;;  %v4090_v23 = vpop.f32.mrf.mxu1 }
 0x21c   : > { %4144 = vst [vmem:[#allocation11_spill] sm:$0xff] %v4090_v23  ;;  %v2056_v23 = vadd.f32 %v3078_v53, %v1991_v35  ;;  %v2007_v10 = vadd.f32 %v3050_v42, %v2764_v39  ;;  %v3127_v21 = vadd.f32 %v3126_v36, %v3125_v34  ;;  %v2183_v27 = vadd.f32 %v3155_v12, %v2118_v52 }
 0x21d   : > { %v3128_v30 = vpop.f32.mrf.mxu0  ;;  %v3172_v19 = vpop.f32.mrf.mxu1  ;;  %v2194_v28 = vadd.f32 %v3164_v16, %v2129_v54  ;;  %v4150_v36 = vld [vmem:[#allocation8_spill] sm:$0xff] }
 0x21e   : > { %v2121_v14 = vadd.f32 %v3118_v48, %v2056_v23  ;;  %v2191_v23 = vadd.f32 %v3161_v24, %v2126_v6  ;;  %v2134_v42 = vadd.f32 %v3127_v21, %v2069_v29  ;;  %v2072_v45 = vadd.f32 %v3090_v50, %v2007_v10 }
 0x21f   : > { %v3129_v43 = vpop.f32.mrf.mxu0  ;;  %v3174_v5 = vpop.f32.mrf.mxu1 }
 0x220   : > { %v3130_v26 = vadd.f32 %v3129_v43, %v3128_v30  ;;  %v2186_v31 = vadd.f32 %v3158_v18, %v2121_v14 }
 0x221   : > { %v3131_v44 = vpop.f32.mrf.mxu0  ;;  %v3175_v32 = vpop.f32.mrf.mxu1  ;;  %v4153_v47 = vld [vmem:[#allocation10_spill] sm:$0xff] }
 0x222   : > { %v2137_v55 = vadd.f32 %v3130_v26, %v2072_v45  ;;  %v3176_v57 = vadd.f32 %v3175_v32, %v3174_v5 }
 0x223   : > { %v3132_v51 = vpop.f32.mrf.mxu0  ;;  %v4151_v60 = vld [vmem:[#allocation11_spill] sm:$0xff]  ;;  %v3351_v1 = vpop.f32.mrf.mxu1 }
 0x224   : > { %v3133_v13 = vadd.f32 %v3132_v51, %v3131_v44  ;;  %v3173_v62 = vadd.f32 %v3172_v19, %v4151_v60 }
 0x225   : > { %v3134_v38 = vpop.f32.mrf.mxu0  ;;  %v2436_v3 = vpop.f32.mrf.mxu1 }
 0x226   : > { %v2142_v0 = vadd.f32 %v3133_v13, %v2077_v33 }
 0x227   : > { %v3135_v17 = vpop.f32.mrf.mxu0  ;;  %v3352_v18 = vpop.f32.mrf.mxu1 }
 0x228   : > { %v3136_v25 = vadd.f32 %v3135_v17, %v3134_v38  ;;  %v4149_v17 = vld [vmem:[#allocation7_spill] sm:$0xff]  ;;  %v4152_v38 = vld [vmem:[#allocation9_spill] sm:$0xff]  ;;  %v2207_v52 = vadd.f32 %v3173_v62, %v2142_v0 }
 0x229   : > { %v3327_v8 = vpop.f32.mrf.mxu0  ;;  %v3167_v53 = vadd.f32 %v4150_v36, %v4149_v17  ;;  %v3170_v48 = vadd.f32 %v4153_v47, %v4152_v38  ;;  %v2439_v20 = vpop.f32.mrf.mxu1 }
 0x22a   : > { %v2256_v35 = vadd.f32 %v3327_v8, %v2191_v23  ;;  %v2145_v46 = vadd.f32 %v3136_v25, %v2080_v15  ;;  %v2893_v25 = vld [vmem:[%s4131_s6] ss:$0 sm:$0xff] }
 0x22b   : > { %v2247_v7 = vpop.f32.mrf.mxu0  ;;  %v2199_v41 = vadd.f32 %v3167_v53, %v2134_v42  ;;  %v2202_v4 = vadd.f32 %v3170_v48, %v2137_v55  ;;  %v3355_v22 = vpop.f32.mrf.mxu1 }
 0x22c   : > { %v2248_v9 = vadd.f32 %v2247_v7, %v2183_v27  ;;  %v2280_v2 = vmax.f32 %v2256_v35, 0.0  ;;  %v2210_v49 = vadd.f32 %v3176_v57, %v2145_v46 }
 0x22d   : > { %v3328_v59 = vpop.f32.mrf.mxu0  ;;  %v2452_v24 = vpop.f32.mrf.mxu1 }
 0x22e   : > { %v2259_v11 = vadd.f32 %v3328_v59, %v2194_v28  ;;  %v2278_v30 = vmax.f32 %v2248_v9, 0.0 }
 0x22f   : > { %v2250_v39 = vpop.f32.mrf.mxu0  ;;  %v3356_v21 = vpop.f32.mrf.mxu1 }
 0x230   : > { %v2251_v34 = vadd.f32 %v2250_v39, %v2186_v31  ;;  %v2281_v44 = vmax.f32 %v2259_v11, 0.0 }
 0x231   : > { %v3331_v51 = vpop.f32.mrf.mxu0  ;;  %v2455_v23 = vpop.f32.mrf.mxu1 }
 0x232   : > { %v2279_v43 = vmax.f32 %v2251_v34, 0.0  ;;  %v2287_v50 = vpack.c.bf16 %v2281_v44, %v2280_v2  ;;  %v2272_v6 = vadd.f32 %v3331_v51, %v2207_v52 }
 0x233   : > { %v2263_v37 = vpop.f32.mrf.mxu0 }
 0x234   : > { %v2286_v40 = vpack.c.bf16 %v2279_v43, %v2278_v30  ;;  %v2264_v56 = vadd.f32 %v2263_v37, %v2199_v41  ;;  %v2284_v16 = vmax.f32 %v2272_v6, 0.0 }
 0x235   : > { %v3332_v54 = vpop.f32.mrf.mxu0 }
 0x236   : > { %v2275_v58 = vadd.f32 %v3332_v54, %v2210_v49  ;;  %3373 = vmatprep.mubr.bf16.mxu0 %v2286_v40  ;;  %v2282_v12 = vmax.f32 %v2264_v56, 0.0 }
 0x237   : > { %v2266_v8 = vpop.f32.mrf.mxu0  ;;  %3374 = vmatmul.mubr.bf16.vlgmr.msra.gmra.mxu0 %v2287_v50 }
 0x238   : > { %v2267_v10 = vadd.f32 %v2266_v8, %v2202_v4  ;;  %v2285_v19 = vmax.f32 %v2275_v58, 0.0 }
 0x23a   : > { %v2283_v14 = vmax.f32 %v2267_v10, 0.0  ;;  %v2289_v63 = vpack.c.bf16 %v2285_v19, %v2284_v16 }
 0x23c   : > { %v2288_v61 = vpack.c.bf16 %v2283_v14, %v2282_v12 }
 0x23e   : > { %3377 = vmatprep.mubr.bf16.mxu1 %v2288_v61 }
 0x23f   : > { %3378 = vmatmul.mubr.bf16.vlgmr.msra.gmra.mxu1 %v2289_v63 }
 0x2f7   : > { %v3375_v5 = vpop.f32.mrf.mxu0 }
 0x2f8   : > { %v2558_v7 = vadd.f32 %v3375_v5, %v3351_v1 }
 0x2f9   : > { %v2549_v27 = vpop.f32.mrf.mxu0 }
 0x2fa   : > { %v2550_v28 = vadd.f32 %v2549_v27, %v2436_v3  ;;  %v2589_v13 = vadd.f32 %v2893_v25, %v2558_v7 }
 0x2fb   : > { %v3376_v29 = vpop.f32.mrf.mxu0 }
 0x2fc   : > { %v2561_v15 = vadd.f32 %v3376_v29, %v3352_v18  ;;  %v2587_v26 = vadd.f32 %v2893_v25, %v2550_v28  ;;  %v2597_v32 = vmax.f32 %v2589_v13, 0.0 }
 0x2fd   : > { %v2552_v59 = vpop.f32.mrf.mxu0 }
 0x2fe   : > { %v2590_v9 = vadd.f32 %v2893_v25, %v2561_v15  ;;  %v2553_v11 = vadd.f32 %v2552_v59, %v2439_v20  ;;  %v2595_v45 = vmax.f32 %v2587_v26, 0.0 }
 0x2ff   : > { %v3379_v31 = vpop.f32.mrf.mxu1 }
 0x300   : > { %v2598_v33 = vmax.f32 %v2590_v9, 0.0  ;;  %v2588_v35 = vadd.f32 %v2893_v25, %v2553_v11  ;;  %v2574_v39 = vadd.f32 %v3379_v31, %v3355_v22 }
 0x301   : > { %v2565_v42 = vpop.f32.mrf.mxu1 }
 0x302   : > { %v2954_v46 = vpack.c.bf16 %v2598_v33, %v2597_v32  ;;  %v2596_v34 = vmax.f32 %v2588_v35, 0.0  ;;  %v2566_v17 = vadd.f32 %v2565_v42, %v2452_v24  ;;  %v2593_v0 = vadd.f32 %v2893_v25, %v2574_v39 }
 0x303   : > { %v3380_v36 = vpop.f32.mrf.mxu1 }
 0x304   : > { %2966 = vst [vmem:[%s305_s21 + $0x8] sm:$0xff] %v2954_v46   ;;  %v2949_v53 = vpack.c.bf16 %v2596_v34, %v2595_v45  ;;  %v2577_v44 = vadd.f32 %v3380_v36, %v3356_v21  ;;  %v2591_v55 = vadd.f32 %v2893_v25, %v2566_v17  ;;  %v2601_v43 = vmax.f32 %v2593_v0, 0.0 }
 0x305   : > { %v2568_v51 = vpop.f32.mrf.mxu1 }
 0x306   : > { %2950 = vst [vmem:[%s305_s21] sm:$0xff] %v2949_v53   ;;  %v2594_v57 = vadd.f32 %v2893_v25, %v2577_v44  ;;  %v2569_v30 = vadd.f32 %v2568_v51, %v2455_v23  ;;  %v2599_v2 = vmax.f32 %v2591_v55, 0.0 }
 0x308   : > { %v2602_v60 = vmax.f32 %v2594_v57, 0.0  ;;  %v2592_v62 = vadd.f32 %v2893_v25, %v2569_v30 }
 0x30a   : > { %v2964_v37 = vpack.c.bf16 %v2602_v60, %v2601_v43  ;;  %v2600_v38 = vmax.f32 %v2592_v62, 0.0 }
 0x30c   : > { %2968 = vst [vmem:[%s305_s21 + $0x18] sm:$0xff] %v2964_v37   ;;  %v2959_v47 = vpack.c.bf16 %v2600_v38, %v2599_v2 }
 0x30e   : > { %2967 = vst [vmem:[%s305_s21 + $0x10] sm:$0xff] %v2959_v47  }
 0x30f PF: > { %s18_s27 = sadd.s32 1, %s3580_s27  }
 0x310   : > { %p15_p4 = scmp.ge.s32.totalorder %s18_s27, 4  }
 0x312   :  { %17 = sbr.rel (!%p15_p4) target bundleno = 1 (0x1), region = 83 }

</bundles_post_ra>
